<compile_context>
chip_gen: v7x
topology: tpu7x:2x2x1
jax: 0.10.0
libtpu: 0.0.40
codegen_flags: <defaults>
</compile_context>

<pallas_src>
import jax
import jax.numpy as jnp
from jax.experimental import pallas as pl
from jax.experimental.pallas import tpu as pltpu


def _flash_attention_kernel(q_ref, k_ref, v_ref, wproj_ref, bproj_ref, o_ref,
                            m_scratch, l_scratch, acc_scratch):
    """One (batch, q-tile, kv-tile) grid step.

    q_ref     : (1, H, tq, hd)   pre-projected, pre-scaled queries (bf16)
    k_ref     : (1, H, tkv, hd)  pre-projected keys (bf16)
    v_ref     : (1, H, tkv, hd)  pre-projected values (bf16)
    wproj_ref : (H, hd, C)       per-head output-projection slab (bf16)
    bproj_ref : (1, C)           output-projection bias (f32)
    o_ref     : (1, tq, C)       lane-dense output tile
    m/l       : (H, tq, 1)       online-softmax running max / sum (f32)
    acc       : (H, tq, hd)      un-normalized context accumulator (f32)
    """
    ki = pl.program_id(2)
    num_kv = pl.num_programs(2)

    @pl.when(ki == 0)
    def _init():
        m_scratch[...] = jnp.full(m_scratch.shape, -jnp.inf,
                                  dtype=m_scratch.dtype)
        l_scratch[...] = jnp.zeros(l_scratch.shape, dtype=l_scratch.dtype)
        acc_scratch[...] = jnp.zeros(acc_scratch.shape,
                                     dtype=acc_scratch.dtype)

    q = q_ref[0]          # (H, tq, hd)  — resident across kv steps (same block)
    k = k_ref[0]          # (H, tkv, hd)
    v = v_ref[0]          # (H, tkv, hd)

    # Scores: heads batched (sublane axis), MXU-native transposed-operand form
    # (no explicit k.T), scale already folded into q.
    s = jnp.einsum('hqd,hkd->hqk', q, k,
                   preferred_element_type=jnp.float32)       # (H, tq, tkv) f32

    # Online softmax update (f32 math).
    m_prev = m_scratch[...]
    m_new = jnp.maximum(m_prev, jnp.max(s, axis=-1, keepdims=True))
    alpha = jnp.exp(m_prev - m_new)
    p = jnp.exp(s - m_new)
    l_scratch[...] = alpha * l_scratch[...] + jnp.sum(p, axis=-1, keepdims=True)
    acc_scratch[...] = alpha * acc_scratch[...] + jnp.einsum(
        'hqk,hkd->hqd', p.astype(v.dtype), v,
        preferred_element_type=jnp.float32)
    m_scratch[...] = m_new

    @pl.when(ki == num_kv - 1)
    def _finalize():
        # Normalize the small (H, tq, hd) context (EUP reciprocal slot).
        ctx = acc_scratch[...] * pl.reciprocal(l_scratch[...], approx=True)
        ctx = ctx.astype(wproj_ref.dtype)
        H = ctx.shape[0]
        tq, C = o_ref.shape[1], o_ref.shape[2]
        # Fused output projection: running accumulation into one (tq, C) f32
        # tile — no (H, tq, C) intermediate, no concatenate, lane-dense store.
        y = jnp.zeros((tq, C), dtype=jnp.float32)
        for h in range(H):  # static unroll over heads
            y = y + jnp.dot(ctx[h], wproj_ref[h],
                            preferred_element_type=jnp.float32)
        y = y + bproj_ref[...]
        o_ref[0] = y.astype(o_ref.dtype)


def attention_pallas(x, qkv_weight, proj_weight, proj_bias, *, num_heads,
                     q_tile=256, kv_tile=256, compute_dtype=jnp.bfloat16):
    """x: (B, N, C).  qkv_weight: (3C, C), proj_weight: (C, C),
    proj_bias: (C,) — PyTorch nn.Linear conventions.

    Note: use q_tile=kv_tile=128 on v5e (128-wide MXU); 256 fills v6e/v7x.
    """
    B, N, C = x.shape
    assert C % num_heads == 0
    hd = C // num_heads
    scale = hd ** -0.5

    tq = min(q_tile, N)
    tkv = min(kv_tile, N)
    # TODO(synk): pad or use pl.BoundedSlice for ragged N; tiling assumes
    # divisibility here.
    assert N % tq == 0 and N % tkv == 0, "N must divide the tile sizes"

    # ---- QKV projection hoisted out of the kernel (one XLA matmul, f32). ----
    qkv = x @ qkv_weight.T                                   # (B, N, 3C)
    qkv = qkv.reshape(B, N, 3, num_heads, hd)
    qkv = jnp.transpose(qkv, (2, 0, 3, 1, 4))                # (3, B, H, N, hd)
    q = (qkv[0] * scale).astype(compute_dtype)               # scale folded in
    k = qkv[1].astype(compute_dtype)
    v = qkv[2].astype(compute_dtype)

    # Per-head output-projection slab + bias (fused into the kernel epilogue).
    wproj_h = proj_weight.T.reshape(num_heads, hd, C).astype(compute_dtype)
    bproj = proj_bias.reshape(1, C).astype(jnp.float32)

    # ---- Derive vmem_limit from actual block/scratch sizes (review item). ----
    def _pad(n, m):
        return ((n + m - 1) // m) * m

    cbytes = jnp.dtype(compute_dtype).itemsize
    obytes = jnp.dtype(x.dtype).itemsize
    tq_p, tkv_p = _pad(tq, 8), _pad(tkv, 8)
    hd_p, C_p = _pad(hd, 128), _pad(C, 128)
    vmem_need = (
        2 * num_heads * tq_p * hd_p * cbytes            # q block (dbl-buffered)
        + 4 * num_heads * tkv_p * hd_p * cbytes         # k + v blocks
        + 2 * num_heads * _pad(hd, 8) * C_p * cbytes    # wproj slab (worst case)
        + 2 * tq_p * C_p * obytes                       # output block
        + 2 * num_heads * tq_p * 128 * 4                # m, l scratch (lane pad)
        + num_heads * tq_p * hd_p * 4                   # acc scratch
        + 8 * 128 * 4                                   # bias tile
    )
    # 2x headroom for compiler temporaries; stay under v7x's 64 MiB/TC.
    vmem_limit = int(min(max(2 * vmem_need, 16 * 1024 * 1024),
                         64 * 1024 * 1024))

    grid = (B, N // tq, N // tkv)

    # TODO(synk): wproj/bias have constant index maps — single-buffering them
    # (pipeline_mode) and Buffered(3) on the kv-side inputs for v5e are further
    # VMEM/latency tweaks left out to keep lowering maximally portable.
    return pl.pallas_call(
        _flash_attention_kernel,
        out_shape=jax.ShapeDtypeStruct((B, N, C), x.dtype),
        grid_spec=pltpu.PrefetchScalarGridSpec(
            num_scalar_prefetch=0,
            grid=grid,
            in_specs=[
                pl.BlockSpec((1, num_heads, tq, hd),
                             lambda b, qi, ki: (b, 0, qi, 0)),
                pl.BlockSpec((1, num_heads, tkv, hd),
                             lambda b, qi, ki: (b, 0, ki, 0)),
                pl.BlockSpec((1, num_heads, tkv, hd),
                             lambda b, qi, ki: (b, 0, ki, 0)),
                pl.BlockSpec((num_heads, hd, C),
                             lambda b, qi, ki: (0, 0, 0)),
                pl.BlockSpec((1, C), lambda b, qi, ki: (0, 0)),
            ],
            out_specs=pl.BlockSpec((1, tq, C), lambda b, qi, ki: (b, qi, 0)),
            scratch_shapes=[
                pltpu.VMEM((num_heads, tq, 1), jnp.float32),   # m
                pltpu.VMEM((num_heads, tq, 1), jnp.float32),   # l
                pltpu.VMEM((num_heads, tq, hd), jnp.float32),  # acc
            ],
        ),
        compiler_params=pltpu.CompilerParams(
            dimension_semantics=("parallel", "parallel", "arbitrary"),
            vmem_limit_bytes=vmem_limit,
        ),
    )(q, k, v, wproj_h, bproj)


def attention_reference(x, qkv_weight, proj_weight, proj_bias, *, num_heads):
    """Plain-JAX f32 mirror of the PyTorch forward (reduction_factor=1, eval)."""
    B, N, C = x.shape
    hd = C // num_heads
    scale = hd ** -0.5
    qkv = x @ qkv_weight.T                                  # (B, N, 3C)
    qkv = qkv.reshape(B, N, 3, num_heads, hd)
    qkv = jnp.transpose(qkv, (2, 0, 3, 1, 4))               # (3, B, H, N, hd)
    q, k, v = qkv[0], qkv[1], qkv[2]
    attn = jnp.einsum('bhqd,bhkd->bhqk', q, k) * scale
    attn = jax.nn.softmax(attn, axis=-1)
    out = jnp.einsum('bhqk,bhkd->bhqd', attn, v)            # (B, H, N, hd)
    out = jnp.transpose(out, (0, 2, 1, 3)).reshape(B, N, C)
    return out @ proj_weight.T + proj_bias


if __name__ == "__main__":
    # TODO(synk): reduction_factor > 1 (extra fc Linear), qkv_bias=True and
    # dropout (training mode) paths are not implemented; module defaults are.
    B, N, C = 2, 8, 32
    num_heads = 8

    key = jax.random.PRNGKey(0)
    kx, kqkv, kproj, kb = jax.random.split(key, 4)
    x = jax.random.normal(kx, (B, N, C), dtype=jnp.float32)
    qkv_weight = 0.1 * jax.random.normal(kqkv, (3 * C, C), dtype=jnp.float32)
    proj_weight = 0.1 * jax.random.normal(kproj, (C, C), dtype=jnp.float32)
    proj_bias = 0.1 * jax.random.normal(kb, (C,), dtype=jnp.float32)

    out = attention_pallas(x, qkv_weight, proj_weight, proj_bias,
                           num_heads=num_heads)
    out = jax.block_until_ready(out)

    ref = attention_reference(x, qkv_weight, proj_weight, proj_bias,
                              num_heads=num_heads)
    assert out.shape == (B, N, C)
    max_err = jnp.max(jnp.abs(out - ref))
    # bf16 MXU operands (f32 accumulation) + approx reciprocal vs f32 reference
    # -> relaxed tolerance.
    assert jnp.allclose(out, ref, rtol=2e-2, atol=2e-2), \
        f"max abs err {max_err}"
    print("KERNEL_OK")
</pallas_src>

<mosaic_0001>
module attributes {stable_mosaic.version = 11 : i64} {
  func.func @_flash_attention_kernel(%arg0: i32, %arg1: i32, %arg2: i32, %arg3: memref<1x8x8x4xbf16, #tpu.memory_space<vmem>>, %arg4: memref<1x8x8x4xbf16, #tpu.memory_space<vmem>>, %arg5: memref<1x8x8x4xbf16, #tpu.memory_space<vmem>>, %arg6: memref<8x4x32xbf16, #tpu.memory_space<vmem>>, %arg7: memref<1x32xf32, #tpu.memory_space<vmem>>, %arg8: memref<1x8x32xf32, #tpu.memory_space<vmem>>, %arg9: memref<8x8x1xf32, #tpu.memory_space<vmem>>, %arg10: memref<8x8x1xf32, #tpu.memory_space<vmem>>, %arg11: memref<8x8x4xf32, #tpu.memory_space<vmem>>) attributes {dimension_semantics = [#tpu.dimension_semantics<parallel>, #tpu.dimension_semantics<parallel>, #tpu.dimension_semantics<arbitrary>], iteration_bounds = array<i64: 2, 1, 1>, scalar_prefetch = 0 : i64, scratch_operands = 3 : i64, tpu.core_type = #tpu.core_type<tc>, window_params = [{transform_indices = @transform_0, window_bounds = array<i64: 1, 8, 8, 4>}, {transform_indices = @transform_1, window_bounds = array<i64: 1, 8, 8, 4>}, {transform_indices = @transform_2, window_bounds = array<i64: 1, 8, 8, 4>}, {pipeline_mode = #tpu.pipeline_mode<synchronous>, transform_indices = @transform_3, window_bounds = array<i64: 8, 4, 32>}, {pipeline_mode = #tpu.pipeline_mode<synchronous>, transform_indices = @transform_4, window_bounds = array<i64: 1, 32>}, {transform_indices = @transform_5, window_bounds = array<i64: 1, 8, 32>}]} {
    %c0_i32 = arith.constant 0 : i32
    %0 = arith.cmpi eq, %arg2, %c0_i32 : i32
    %1 = arith.extui %0 : i1 to i32
    %c0_i32_0 = arith.constant 0 : i32
    %2 = arith.cmpi ne, %1, %c0_i32_0 : i32
    scf.if %2 {
      %cst_35 = arith.constant 0xFF800000 : f32
      %36 = vector.broadcast %cst_35 : f32 to vector<8x8x1xf32>
      %c0_36 = arith.constant 0 : index
      %c0_37 = arith.constant 0 : index
      %c0_38 = arith.constant 0 : index
      %37 = vector.load %arg9[%c0_36, %c0_37, %c0_38] : memref<8x8x1xf32, #tpu.memory_space<vmem>>, vector<8x8x1xf32>
      tpu.vector_store %arg9[%c0_36, %c0_37, %c0_38], %36 {strides = array<i32>} : memref<8x8x1xf32, #tpu.memory_space<vmem>>, vector<8x8x1xf32>,
      %cst_39 = arith.constant 0.000000e+00 : f32
      %38 = vector.broadcast %cst_39 : f32 to vector<8x8x1xf32>
      %c0_40 = arith.constant 0 : index
      %c0_41 = arith.constant 0 : index
      %c0_42 = arith.constant 0 : index
      %39 = vector.load %arg10[%c0_40, %c0_41, %c0_42] : memref<8x8x1xf32, #tpu.memory_space<vmem>>, vector<8x8x1xf32>
      tpu.vector_store %arg10[%c0_40, %c0_41, %c0_42], %38 {strides = array<i32>} : memref<8x8x1xf32, #tpu.memory_space<vmem>>, vector<8x8x1xf32>,
      %cst_43 = arith.constant 0.000000e+00 : f32
      %40 = vector.broadcast %cst_43 : f32 to vector<8x8x4xf32>
      %c0_44 = arith.constant 0 : index
      %c0_45 = arith.constant 0 : index
      %c0_46 = arith.constant 0 : index
      %41 = vector.load %arg11[%c0_44, %c0_45, %c0_46] : memref<8x8x4xf32, #tpu.memory_space<vmem>>, vector<8x8x4xf32>
      tpu.vector_store %arg11[%c0_44, %c0_45, %c0_46], %40 {strides = array<i32>} : memref<8x8x4xf32, #tpu.memory_space<vmem>>, vector<8x8x4xf32>,
    } else {
    }
    %c0 = arith.constant 0 : index
    %c0_1 = arith.constant 0 : index
    %c0_2 = arith.constant 0 : index
    %c0_3 = arith.constant 0 : index
    %3 = vector.load %arg3[%c0, %c0_1, %c0_2, %c0_3] : memref<1x8x8x4xbf16, #tpu.memory_space<vmem>>, vector<1x8x8x4xbf16>
    %4 = vector.shape_cast %3 : vector<1x8x8x4xbf16> to vector<8x8x4xbf16>
    %c0_4 = arith.constant 0 : index
    %c0_5 = arith.constant 0 : index
    %c0_6 = arith.constant 0 : index
    %c0_7 = arith.constant 0 : index
    %5 = vector.load %arg4[%c0_4, %c0_5, %c0_6, %c0_7] : memref<1x8x8x4xbf16, #tpu.memory_space<vmem>>, vector<1x8x8x4xbf16>
    %6 = vector.shape_cast %5 : vector<1x8x8x4xbf16> to vector<8x8x4xbf16>
    %c0_8 = arith.constant 0 : index
    %c0_9 = arith.constant 0 : index
    %c0_10 = arith.constant 0 : index
    %c0_11 = arith.constant 0 : index
    %7 = vector.load %arg5[%c0_8, %c0_9, %c0_10, %c0_11] : memref<1x8x8x4xbf16, #tpu.memory_space<vmem>>, vector<1x8x8x4xbf16>
    %8 = vector.shape_cast %7 : vector<1x8x8x4xbf16> to vector<8x8x4xbf16>
    "tpu.trace_start"() <{level = 10 : i32, message = "hqd,hkd->hqk"}> : () -> ()
    %cst = arith.constant dense<0.000000e+00> : vector<8x8x8xf32>
    %9 = tpu.matmul %4, %6, %cst {dimension_numbers = #tpu.dot_dimension_numbers<[2], [2], [1], [1], [0, 0, 0, 1, 1, 1], [0], [0]>} : vector<8x8x4xbf16>, vector<8x8x4xbf16>, vector<8x8x8xf32> -> vector<8x8x8xf32>
    "tpu.trace_stop"() : () -> ()
    %c0_12 = arith.constant 0 : index
    %c0_13 = arith.constant 0 : index
    %c0_14 = arith.constant 0 : index
    %10 = vector.load %arg9[%c0_12, %c0_13, %c0_14] : memref<8x8x1xf32, #tpu.memory_space<vmem>>, vector<8x8x1xf32>
    %cst_15 = arith.constant dense<0xFF800000> : vector<8x8xf32>
    %11 = vector.multi_reduction <maximumf>, %9, %cst_15 [2] : vector<8x8x8xf32> to vector<8x8xf32>
    %12 = vector.shape_cast %11 : vector<8x8xf32> to vector<8x8x1xf32>
    %13 = arith.maximumf %10, %12 : vector<8x8x1xf32>
    %14 = arith.subf %10, %13 : vector<8x8x1xf32>
    %15 = math.exp %14 : vector<8x8x1xf32>
    %16 = vector.broadcast %13 : vector<8x8x1xf32> to vector<8x8x8xf32>
    %17 = arith.subf %9, %16 : vector<8x8x8xf32>
    %18 = math.exp %17 : vector<8x8x8xf32>
    %c0_16 = arith.constant 0 : index
    %c0_17 = arith.constant 0 : index
    %c0_18 = arith.constant 0 : index
    %19 = vector.load %arg10[%c0_16, %c0_17, %c0_18] : memref<8x8x1xf32, #tpu.memory_space<vmem>>, vector<8x8x1xf32>
    %20 = arith.mulf %15, %19 : vector<8x8x1xf32>
    %cst_19 = arith.constant dense<0.000000e+00> : vector<8x8xf32>
    %21 = vector.multi_reduction <add>, %18, %cst_19 [2] : vector<8x8x8xf32> to vector<8x8xf32>
    %22 = vector.shape_cast %21 : vector<8x8xf32> to vector<8x8x1xf32>
    %23 = arith.addf %20, %22 : vector<8x8x1xf32>
    %c0_20 = arith.constant 0 : index
    %c0_21 = arith.constant 0 : index
    %c0_22 = arith.constant 0 : index
    %24 = vector.load %arg10[%c0_20, %c0_21, %c0_22] : memref<8x8x1xf32, #tpu.memory_space<vmem>>, vector<8x8x1xf32>
    tpu.vector_store %arg10[%c0_20, %c0_21, %c0_22], %23 {strides = array<i32>} : memref<8x8x1xf32, #tpu.memory_space<vmem>>, vector<8x8x1xf32>,
    %c0_23 = arith.constant 0 : index
    %c0_24 = arith.constant 0 : index
    %c0_25 = arith.constant 0 : index
    %25 = vector.load %arg11[%c0_23, %c0_24, %c0_25] : memref<8x8x4xf32, #tpu.memory_space<vmem>>, vector<8x8x4xf32>
    %26 = vector.broadcast %15 : vector<8x8x1xf32> to vector<8x8x4xf32>
    %27 = arith.mulf %26, %25 : vector<8x8x4xf32>
    %28 = arith.truncf %18 : vector<8x8x8xf32> to vector<8x8x8xbf16>
    "tpu.trace_start"() <{level = 10 : i32, message = "hqk,hkd->hqd"}> : () -> ()
    %cst_26 = arith.constant dense<0.000000e+00> : vector<8x8x4xf32>
    %29 = tpu.matmul %28, %8, %cst_26 {dimension_numbers = #tpu.dot_dimension_numbers<[2], [1], [1], [2], [0, 0, 0, 1, 1, 2], [0], [0]>} : vector<8x8x8xbf16>, vector<8x8x4xbf16>, vector<8x8x4xf32> -> vector<8x8x4xf32>
    "tpu.trace_stop"() : () -> ()
    %30 = arith.addf %27, %29 : vector<8x8x4xf32>
    %c0_27 = arith.constant 0 : index
    %c0_28 = arith.constant 0 : index
    %c0_29 = arith.constant 0 : index
    %31 = vector.load %arg11[%c0_27, %c0_28, %c0_29] : memref<8x8x4xf32, #tpu.memory_space<vmem>>, vector<8x8x4xf32>
    tpu.vector_store %arg11[%c0_27, %c0_28, %c0_29], %30 {strides = array<i32>} : memref<8x8x4xf32, #tpu.memory_space<vmem>>, vector<8x8x4xf32>,
    %c0_30 = arith.constant 0 : index
    %c0_31 = arith.constant 0 : index
    %c0_32 = arith.constant 0 : index
    %32 = vector.load %arg9[%c0_30, %c0_31, %c0_32] : memref<8x8x1xf32, #tpu.memory_space<vmem>>, vector<8x8x1xf32>
    tpu.vector_store %arg9[%c0_30, %c0_31, %c0_32], %13 {strides = array<i32>} : memref<8x8x1xf32, #tpu.memory_space<vmem>>, vector<8x8x1xf32>,
    %c0_i32_33 = arith.constant 0 : i32
    %33 = arith.cmpi eq, %arg2, %c0_i32_33 : i32
    %34 = arith.extui %33 : i1 to i32
    %c0_i32_34 = arith.constant 0 : i32
    %35 = arith.cmpi ne, %34, %c0_i32_34 : i32
    scf.if %35 {
      %c0_35 = arith.constant 0 : index
      %c0_36 = arith.constant 0 : index
      %c0_37 = arith.constant 0 : index
      %36 = vector.load %arg11[%c0_35, %c0_36, %c0_37] : memref<8x8x4xf32, #tpu.memory_space<vmem>>, vector<8x8x4xf32>
      %c0_38 = arith.constant 0 : index
      %c0_39 = arith.constant 0 : index
      %c0_40 = arith.constant 0 : index
      %37 = vector.load %arg10[%c0_38, %c0_39, %c0_40] : memref<8x8x1xf32, #tpu.memory_space<vmem>>, vector<8x8x1xf32>
      %38 = tpu.reciprocal %37 {approx = true} : vector<8x8x1xf32> -> vector<8x8x1xf32>
      %39 = vector.broadcast %38 : vector<8x8x1xf32> to vector<8x8x4xf32>
      %40 = arith.mulf %36, %39 : vector<8x8x4xf32>
      %41 = arith.truncf %40 : vector<8x8x4xf32> to vector<8x8x4xbf16>
      %cst_41 = arith.constant 0.000000e+00 : f32
      %42 = vector.broadcast %cst_41 : f32 to vector<8x32xf32>
      %43 = vector.extract_strided_slice %41 {offsets = [0, 0, 0], sizes = [1, 8, 4], strides = [1, 1, 1]} : vector<8x8x4xbf16> to vector<1x8x4xbf16>
      %44 = vector.shape_cast %43 : vector<1x8x4xbf16> to vector<8x4xbf16>
      %c0_42 = arith.constant 0 : index
      %c0_43 = arith.constant 0 : index
      %c0_44 = arith.constant 0 : index
      %45 = vector.load %arg6[%c0_42, %c0_43, %c0_44] : memref<8x4x32xbf16, #tpu.memory_space<vmem>>, vector<1x4x32xbf16>
      %46 = vector.shape_cast %45 : vector<1x4x32xbf16> to vector<4x32xbf16>
      %cst_45 = arith.constant dense<0.000000e+00> : vector<8x32xf32>
      %47 = tpu.matmul %44, %46, %cst_45 {dimension_numbers = #tpu.dot_dimension_numbers<[1], [0], [0], [1], [0, 0, 1, 1], [], []>} : vector<8x4xbf16>, vector<4x32xbf16>, vector<8x32xf32> -> vector<8x32xf32>
      %48 = arith.addf %42, %47 : vector<8x32xf32>
      %49 = vector.extract_strided_slice %41 {offsets = [1, 0, 0], sizes = [1, 8, 4], strides = [1, 1, 1]} : vector<8x8x4xbf16> to vector<1x8x4xbf16>
      %50 = vector.shape_cast %49 : vector<1x8x4xbf16> to vector<8x4xbf16>
      %c1 = arith.constant 1 : index
      %c0_46 = arith.constant 0 : index
      %c0_47 = arith.constant 0 : index
      %51 = vector.load %arg6[%c1, %c0_46, %c0_47] : memref<8x4x32xbf16, #tpu.memory_space<vmem>>, vector<1x4x32xbf16>
      %52 = vector.shape_cast %51 : vector<1x4x32xbf16> to vector<4x32xbf16>
      %cst_48 = arith.constant dense<0.000000e+00> : vector<8x32xf32>
      %53 = tpu.matmul %50, %52, %cst_48 {dimension_numbers = #tpu.dot_dimension_numbers<[1], [0], [0], [1], [0, 0, 1, 1], [], []>} : vector<8x4xbf16>, vector<4x32xbf16>, vector<8x32xf32> -> vector<8x32xf32>
      %54 = arith.addf %48, %53 : vector<8x32xf32>
      %55 = vector.extract_strided_slice %41 {offsets = [2, 0, 0], sizes = [1, 8, 4], strides = [1, 1, 1]} : vector<8x8x4xbf16> to vector<1x8x4xbf16>
      %56 = vector.shape_cast %55 : vector<1x8x4xbf16> to vector<8x4xbf16>
      %c2 = arith.constant 2 : index
      %c0_49 = arith.constant 0 : index
      %c0_50 = arith.constant 0 : index
      %57 = vector.load %arg6[%c2, %c0_49, %c0_50] : memref<8x4x32xbf16, #tpu.memory_space<vmem>>, vector<1x4x32xbf16>
      %58 = vector.shape_cast %57 : vector<1x4x32xbf16> to vector<4x32xbf16>
      %cst_51 = arith.constant dense<0.000000e+00> : vector<8x32xf32>
      %59 = tpu.matmul %56, %58, %cst_51 {dimension_numbers = #tpu.dot_dimension_numbers<[1], [0], [0], [1], [0, 0, 1, 1], [], []>} : vector<8x4xbf16>, vector<4x32xbf16>, vector<8x32xf32> -> vector<8x32xf32>
      %60 = arith.addf %54, %59 : vector<8x32xf32>
      %61 = vector.extract_strided_slice %41 {offsets = [3, 0, 0], sizes = [1, 8, 4], strides = [1, 1, 1]} : vector<8x8x4xbf16> to vector<1x8x4xbf16>
      %62 = vector.shape_cast %61 : vector<1x8x4xbf16> to vector<8x4xbf16>
      %c3 = arith.constant 3 : index
      %c0_52 = arith.constant 0 : index
      %c0_53 = arith.constant 0 : index
      %63 = vector.load %arg6[%c3, %c0_52, %c0_53] : memref<8x4x32xbf16, #tpu.memory_space<vmem>>, vector<1x4x32xbf16>
      %64 = vector.shape_cast %63 : vector<1x4x32xbf16> to vector<4x32xbf16>
      %cst_54 = arith.constant dense<0.000000e+00> : vector<8x32xf32>
      %65 = tpu.matmul %62, %64, %cst_54 {dimension_numbers = #tpu.dot_dimension_numbers<[1], [0], [0], [1], [0, 0, 1, 1], [], []>} : vector<8x4xbf16>, vector<4x32xbf16>, vector<8x32xf32> -> vector<8x32xf32>
      %66 = arith.addf %60, %65 : vector<8x32xf32>
      %67 = vector.extract_strided_slice %41 {offsets = [4, 0, 0], sizes = [1, 8, 4], strides = [1, 1, 1]} : vector<8x8x4xbf16> to vector<1x8x4xbf16>
      %68 = vector.shape_cast %67 : vector<1x8x4xbf16> to vector<8x4xbf16>
      %c4 = arith.constant 4 : index
      %c0_55 = arith.constant 0 : index
      %c0_56 = arith.constant 0 : index
      %69 = vector.load %arg6[%c4, %c0_55, %c0_56] : memref<8x4x32xbf16, #tpu.memory_space<vmem>>, vector<1x4x32xbf16>
      %70 = vector.shape_cast %69 : vector<1x4x32xbf16> to vector<4x32xbf16>
      %cst_57 = arith.constant dense<0.000000e+00> : vector<8x32xf32>
      %71 = tpu.matmul %68, %70, %cst_57 {dimension_numbers = #tpu.dot_dimension_numbers<[1], [0], [0], [1], [0, 0, 1, 1], [], []>} : vector<8x4xbf16>, vector<4x32xbf16>, vector<8x32xf32> -> vector<8x32xf32>
      %72 = arith.addf %66, %71 : vector<8x32xf32>
      %73 = vector.extract_strided_slice %41 {offsets = [5, 0, 0], sizes = [1, 8, 4], strides = [1, 1, 1]} : vector<8x8x4xbf16> to vector<1x8x4xbf16>
      %74 = vector.shape_cast %73 : vector<1x8x4xbf16> to vector<8x4xbf16>
      %c5 = arith.constant 5 : index
      %c0_58 = arith.constant 0 : index
      %c0_59 = arith.constant 0 : index
      %75 = vector.load %arg6[%c5, %c0_58, %c0_59] : memref<8x4x32xbf16, #tpu.memory_space<vmem>>, vector<1x4x32xbf16>
      %76 = vector.shape_cast %75 : vector<1x4x32xbf16> to vector<4x32xbf16>
      %cst_60 = arith.constant dense<0.000000e+00> : vector<8x32xf32>
      %77 = tpu.matmul %74, %76, %cst_60 {dimension_numbers = #tpu.dot_dimension_numbers<[1], [0], [0], [1], [0, 0, 1, 1], [], []>} : vector<8x4xbf16>, vector<4x32xbf16>, vector<8x32xf32> -> vector<8x32xf32>
      %78 = arith.addf %72, %77 : vector<8x32xf32>
      %79 = vector.extract_strided_slice %41 {offsets = [6, 0, 0], sizes = [1, 8, 4], strides = [1, 1, 1]} : vector<8x8x4xbf16> to vector<1x8x4xbf16>
      %80 = vector.shape_cast %79 : vector<1x8x4xbf16> to vector<8x4xbf16>
      %c6 = arith.constant 6 : index
      %c0_61 = arith.constant 0 : index
      %c0_62 = arith.constant 0 : index
      %81 = vector.load %arg6[%c6, %c0_61, %c0_62] : memref<8x4x32xbf16, #tpu.memory_space<vmem>>, vector<1x4x32xbf16>
      %82 = vector.shape_cast %81 : vector<1x4x32xbf16> to vector<4x32xbf16>
      %cst_63 = arith.constant dense<0.000000e+00> : vector<8x32xf32>
      %83 = tpu.matmul %80, %82, %cst_63 {dimension_numbers = #tpu.dot_dimension_numbers<[1], [0], [0], [1], [0, 0, 1, 1], [], []>} : vector<8x4xbf16>, vector<4x32xbf16>, vector<8x32xf32> -> vector<8x32xf32>
      %84 = arith.addf %78, %83 : vector<8x32xf32>
      %85 = vector.extract_strided_slice %41 {offsets = [7, 0, 0], sizes = [1, 8, 4], strides = [1, 1, 1]} : vector<8x8x4xbf16> to vector<1x8x4xbf16>
      %86 = vector.shape_cast %85 : vector<1x8x4xbf16> to vector<8x4xbf16>
      %c7 = arith.constant 7 : index
      %c0_64 = arith.constant 0 : index
      %c0_65 = arith.constant 0 : index
      %87 = vector.load %arg6[%c7, %c0_64, %c0_65] : memref<8x4x32xbf16, #tpu.memory_space<vmem>>, vector<1x4x32xbf16>
      %88 = vector.shape_cast %87 : vector<1x4x32xbf16> to vector<4x32xbf16>
      %cst_66 = arith.constant dense<0.000000e+00> : vector<8x32xf32>
      %89 = tpu.matmul %86, %88, %cst_66 {dimension_numbers = #tpu.dot_dimension_numbers<[1], [0], [0], [1], [0, 0, 1, 1], [], []>} : vector<8x4xbf16>, vector<4x32xbf16>, vector<8x32xf32> -> vector<8x32xf32>
      %90 = arith.addf %84, %89 : vector<8x32xf32>
      %c0_67 = arith.constant 0 : index
      %c0_68 = arith.constant 0 : index
      %91 = vector.load %arg7[%c0_67, %c0_68] : memref<1x32xf32, #tpu.memory_space<vmem>>, vector<1x32xf32>
      %92 = vector.broadcast %91 : vector<1x32xf32> to vector<8x32xf32>
      %93 = arith.addf %90, %92 : vector<8x32xf32>
      %c0_69 = arith.constant 0 : index
      %c0_70 = arith.constant 0 : index
      %c0_71 = arith.constant 0 : index
      %94 = vector.load %arg8[%c0_69, %c0_70, %c0_71] : memref<1x8x32xf32, #tpu.memory_space<vmem>>, vector<1x8x32xf32>
      %95 = vector.shape_cast %94 : vector<1x8x32xf32> to vector<8x32xf32>
      %96 = vector.shape_cast %93 : vector<8x32xf32> to vector<1x8x32xf32>
      tpu.vector_store %arg8[%c0_69, %c0_70, %c0_71], %96 {strides = array<i32>} : memref<1x8x32xf32, #tpu.memory_space<vmem>>, vector<1x8x32xf32>,
    } else {
    }
    return
  }
  func.func @transform_0(%arg0: i32, %arg1: i32, %arg2: i32) -> (i32, i32, i32, i32) {
    %c0_i32 = arith.constant 0 : i32
    %c0_i32_0 = arith.constant 0 : i32
    %c0_i32_1 = arith.constant 0 : i32
    return %arg0, %c0_i32, %arg1, %c0_i32_0 : i32, i32, i32, i32
  }
  func.func @transform_1(%arg0: i32, %arg1: i32, %arg2: i32) -> (i32, i32, i32, i32) {
    %c0_i32 = arith.constant 0 : i32
    %c0_i32_0 = arith.constant 0 : i32
    %c0_i32_1 = arith.constant 0 : i32
    return %arg0, %c0_i32, %arg2, %c0_i32_0 : i32, i32, i32, i32
  }
  func.func @transform_2(%arg0: i32, %arg1: i32, %arg2: i32) -> (i32, i32, i32, i32) {
    %c0_i32 = arith.constant 0 : i32
    %c0_i32_0 = arith.constant 0 : i32
    %c0_i32_1 = arith.constant 0 : i32
    return %arg0, %c0_i32, %arg2, %c0_i32_0 : i32, i32, i32, i32
  }
  func.func @transform_3(%arg0: i32, %arg1: i32, %arg2: i32) -> (i32, i32, i32) {
    %c0_i32 = arith.constant 0 : i32
    %c0_i32_0 = arith.constant 0 : i32
    %c0_i32_1 = arith.constant 0 : i32
    %c0_i32_2 = arith.constant 0 : i32
    return %c0_i32, %c0_i32_0, %c0_i32_1 : i32, i32, i32
  }
  func.func @transform_4(%arg0: i32, %arg1: i32, %arg2: i32) -> (i32, i32) {
    %c0_i32 = arith.constant 0 : i32
    %c0_i32_0 = arith.constant 0 : i32
    %c0_i32_1 = arith.constant 0 : i32
    return %c0_i32, %c0_i32_0 : i32, i32
  }
  func.func @transform_5(%arg0: i32, %arg1: i32, %arg2: i32) -> (i32, i32, i32) {
    %c0_i32 = arith.constant 0 : i32
    %c0_i32_0 = arith.constant 0 : i32
    return %arg0, %arg1, %c0_i32 : i32, i32, i32
  }
}

</mosaic_0001>

<bundles_post_ra>
// kernel: tpu_custom_call.1
= control target key start
LH: loop header
LB: loop body
LE: loop exit
PB: predicated region body
PF: predicated region fallthrough
CT: control target
= control target key end

     0   :  { %10 = vsyncpa [#allocation6], 0  ;;  %s2979_s0 = inlined_call_operand.vmem [shape: bf16[2,8,8,4], index: 0, kind: input, shape index: {}]   ;;  %s2980_s1 = inlined_call_operand.vmem [shape: bf16[2,8,8,4], index: 1, kind: input, shape index: {}]   ;;  %s2981_s2 = inlined_call_operand.vmem [shape: bf16[2,8,8,4], index: 2, kind: input, shape index: {}]   ;;  %s2982_s3 = inlined_call_operand.vmem [shape: bf16[8,4,32], index: 3, kind: input, shape index: {}]   ;;  %s2983_s4 = inlined_call_operand.vmem [shape: f32[1,32], index: 4, kind: input, shape index: {}]   ;;  %s2984_s5 = inlined_call_operand.hbm [shape: f32[2,8,32], index: 5, kind: output, shape index: {}]  }
   0x1   :  { %12 = vsyncpa [#allocation6 + $0x1], 0  ;;  %s2462_s18 = smov 0   ;;  %s2464_s19 = smov 0  }
   0x2   :  { %s2466_s20 = smov 0   ;;  %s2468_s21 = smov 0  }
   0x3   :  { %s2470_s22 = smov 0   ;;  %s2472_s23 = smov 0  }
   0x4 LB: > { %s1995_s24 = sadd.s32 4294967295, %s2425_s23   ;;  %s1996_s25 = sadd.s32 4294967294, %s2425_s23   ;;  %s2425_s23 = sphi %s2472_s23, %s18_s23   ;;  %s2421_s22 = sphi %s2470_s22, %s2991_s22   ;;  %s2417_s21 = sphi %s2468_s21, %s2990_s21   ;;  %s2413_s20 = sphi %s2466_s20, %s2989_s20   ;;  %s2409_s19 = sphi %s2464_s19, %s2988_s19   ;;  %s2405_s18 = sphi %s2462_s18, %s2987_s18  }
   0x5   : > { %s37_s26 = sadd.s32 1, %s2421_s22  ;;  %s172_s27 = sadd.s32 1, %s2413_s20 }
   0x6   : > { %p39_p0 = scmp.ge.s32.totalorder %s37_s26, 2  ;;  %p182_p1 = scmp.ne.s32.totalorder %s2413_s20, %s2409_s19 }
   0x7   : > { %p183_p2 = scmp.eq.s32.totalorder %s1995_s24, 1  ;;  %p188_p3 = scmp.ne.s32.totalorder %s2409_s19, %s2405_s18 }
   0x8   : > { %s2993_s26 = smov (%p39_p0, %s37_s26), 0  ;;  %p189_p5 = scmp.eq.s32.totalorder %s1996_s25, 1 }
   0x9   : > { %p2502_p4 = por %p183_p2, %p182_p1  ;;  %s167_s29 = ssub.s32 %s2421_s22, %s2993_s26 }
   0xa   : > { %p1999_p6 = scmp.ge.s32.totalorder %s2425_s23, 1  ;;  %p170_p7 = scmp.eq.s32.totalorder %s167_s29, 0 }
   0xb   : > { %p2509_p8 = por %p189_p5, %p188_p3  ;;  %p246_p9 = scmp.lt.s32.totalorder %s2425_s23, 3 }
   0xc   : > { %s2515_s6 = scalar_select %p170_p7, %s2413_s20, %s172_s27  }
   0xd   : > { %p247_p10 = pnand %p1999_p6, %p246_p9 }
   0xe   : > { %p293_p11 = scmp.lt.s32.totalorder (!%p247_p10), %s2417_s21, 1  ;;  %vm339_vm0 = vcmask (!%p247_p10), 31744   ;;  %v2427_v0 = vmov (!%p247_p10), 0.0   ;;  %vm2428_vm1 = vmmov (!%p247_p10), 0   ;;  %vm322_vm2 = vcmask (!%p247_p10), 7168   ;;  %s290_s25 = sand.u32 (!%p247_p10), 1, %s2409_s19  }
   0xf   : > { %250 = sbr.rel (%p247_p10) target bundleno = 1091 (0x443), region = 40  ;;  %2094 = vmatprep.subr.bf16.mxu0 (!%p247_p10), %v2427_v0  ;;  %340 = vst.msk [vmem:[#allocation4] sm:$0xff] (!%p247_p10), %vm339_vm0, %v2427_v0  ;;  %341 = vst.msk [vmem:[#allocation4 + $0x8] sm:$0xff] (!%p247_p10), %vm339_vm0, %v2427_v0  ;;  %2100 = vmatprep.subr.bf16.mxu1 (!%p247_p10), %v2427_v0  ;;  %v2429_v25 = vmov (!%p247_p10), -inf   ;;  %vm749_vm3 = vcmask (!%p247_p10), 64512   ;;  %v2430_v52 = vmov (!%p247_p10), 0  }
  0x10   : > { %342 = vst.msk [vmem:[#allocation4 + $0x10] sm:$0xff] (!%p247_p10), %vm339_vm0, %v2427_v0  ;;  %343 = vst.msk [vmem:[#allocation4 + $0x18] sm:$0xff] (!%p247_p10), %vm339_vm0, %v2427_v0  ;;  %2096 = vmatprep.mubr.msk.bf16.mxu0 (!%p247_p10), %vm2428_vm1, %v2427_v0  ;;  %2102 = vmatprep.mubr.msk.bf16.mxu1 (!%p247_p10), %vm2428_vm1, %v2427_v0  ;;  %vm994_vm4 = vcmask (!%p247_p10), 1043456   ;;  %vm1473_vm5 = vcmask (!%p247_p10), 1041408   ;;  %s2000_s27 = sshll.u32 (!%p247_p10), %s290_s25, 3  ;;  %vm1865_vm6 = vcmask (!%p247_p10), 261120  }
  0x11   : > { %344 = vst.msk [vmem:[#allocation4 + $0x20] sm:$0xff] (!%p247_p10), %vm339_vm0, %v2427_v0  ;;  %345 = vst.msk [vmem:[#allocation4 + $0x28] sm:$0xff] (!%p247_p10), %vm339_vm0, %v2427_v0  ;;  %2297 = vset.pattern.permute.xlu0 (!%p247_p10), %v2430_v52  ;;  %2298 = vset.pattern.permute.xlu1 (!%p247_p10), %v2430_v52  ;;  %s292_s9 = scalar_lea.vmem (!%p247_p10), [#allocation5], %s2000_s27  ;;  %s2431_s15 = smov (!%p247_p10), [#allocation5]  }
  0x12   : > { %346 = vst.msk [vmem:[#allocation4 + $0x30] sm:$0xff] (!%p247_p10), %vm339_vm0, %v2427_v0  ;;  %347 = vst.msk [vmem:[#allocation4 + $0x38] sm:$0xff] (!%p247_p10), %vm339_vm0, %v2427_v0  ;;  %s1882_s10 = sshll.u32 (!%p247_p10), %s292_s9, 4  ;;  %s2351_s16 = sshll.u32 (!%p247_p10), %s2431_s15, 4  ;;  %s2934_s10 = int_to_ptr.vmem [resolvable:$true] %s1882_s10  ;;  %s2352_s16 = int_to_ptr.vmem [resolvable:$false] %s2351_s16 }
  0x13   : > { %323 = vst.msk [vmem:[#allocation2] sm:$0xff] (!%p247_p10), %vm322_vm2, %v2429_v25  ;;  %324 = vst.msk [vmem:[#allocation2 + $0x8] sm:$0xff] (!%p247_p10), %vm322_vm2, %v2429_v25  ;;  %p2354_p1 = scmp.lt.s32.totalorder (!%p247_p10), %s2934_s10, %s2352_s16 }
  0x14   : > { %325 = vst.msk [vmem:[#allocation2 + $0x10] sm:$0xff] (!%p247_p10), %vm322_vm2, %v2429_v25  ;;  %326 = vst.msk [vmem:[#allocation2 + $0x18] sm:$0xff] (!%p247_p10), %vm322_vm2, %v2429_v25 }
  0x15   : > { %327 = vst.msk [vmem:[#allocation2 + $0x20] sm:$0xff] (!%p247_p10), %vm322_vm2, %v2429_v25  ;;  %328 = vst.msk [vmem:[#allocation2 + $0x28] sm:$0xff] (!%p247_p10), %vm322_vm2, %v2429_v25 }
  0x16   : > { %s294_s7 = scalar_select %p293_p11, %s2417_s21, 1  ;;  %329 = vst.msk [vmem:[#allocation2 + $0x30] sm:$0xff] %vm322_vm2, %v2429_v25  ;;  %330 = vst.msk [vmem:[#allocation2 + $0x38] sm:$0xff] %vm322_vm2, %v2429_v25 }
  0x17   : > { %331 = vst.msk [vmem:[#allocation3] sm:$0xff] %vm322_vm2, %v2427_v0  ;;  %332 = vst.msk [vmem:[#allocation3 + $0x8] sm:$0xff] %vm322_vm2, %v2427_v0 }
  0x18   : > { %s2541_s8 = sshll.u32 %s294_s7, 5  ;;  %333 = vst.msk [vmem:[#allocation3 + $0x10] sm:$0xff] %vm322_vm2, %v2427_v0  ;;  %334 = vst.msk [vmem:[#allocation3 + $0x18] sm:$0xff] %vm322_vm2, %v2427_v0 }
  0x19   : > { %s2547_s11 = scalar_lea.vmem %s2980_s1, %s2541_s8  ;;  %s2557_s14 = scalar_lea.vmem %s2979_s0, %s2541_s8  ;;  %335 = vst.msk [vmem:[#allocation3 + $0x20] sm:$0xff] %vm322_vm2, %v2427_v0  ;;  %336 = vst.msk [vmem:[#allocation3 + $0x28] sm:$0xff] %vm322_vm2, %v2427_v0 }
  0x1a   : > { %v356_v1 = vld [vmem:[%s2547_s11] sm:$0xf]  ;;  %v357_v2 = vld [vmem:[%s2547_s11 + $0x4] sm:$0xf]  ;;  %v358_v5 = vld [vmem:[%s2547_s11 + $0x8] sm:$0xf]  ;;  %s2710_s17 = scalar_lea.vmem %s2981_s2, %s2541_s8 }
  0x1b   : > { %v377_v3 = vsel %vm339_vm0, %v356_v1, 0  ;;  %v423_v4 = vsel %vm339_vm0, %v357_v2, 0  ;;  %v359_v6 = vld [vmem:[%s2547_s11 + $0xc] sm:$0xf]  ;;  %v348_v7 = vld [vmem:[%s2557_s14] sm:$0xf] }
  0x1c   : > { %2095 = vmatpush3.bf16.xpose.msra.mxu0 %v377_v3  ;;  %2101 = vmatpush3.bf16.xpose.msra.mxu1 %v423_v4  ;;  %v349_v8 = vld [vmem:[%s2557_s14 + $0x4] sm:$0xf]  ;;  %v469_v9 = vsel %vm339_vm0, %v358_v5, 0  ;;  %v515_v10 = vsel %vm339_vm0, %v359_v6, 0  ;;  %v360_v11 = vld [vmem:[%s2547_s11 + $0x10] sm:$0xf] }
  0x1d   : > { %2106 = vmatprep.subr.bf16.mxu0 %v2427_v0  ;;  %2112 = vmatprep.subr.bf16.mxu1 %v2427_v0  ;;  %v361_v12 = vld [vmem:[%s2547_s11 + $0x14] sm:$0xf]  ;;  %v350_v13 = vld [vmem:[%s2557_s14 + $0x8] sm:$0xf]  ;;  %v351_v14 = vld [vmem:[%s2557_s14 + $0xc] sm:$0xf] }
  0x1e   : > { %v561_v15 = vsel %vm339_vm0, %v360_v11, 0  ;;  %v607_v16 = vsel %vm339_vm0, %v361_v12, 0  ;;  %v362_v17 = vld [vmem:[%s2547_s11 + $0x18] sm:$0xf]  ;;  %v363_v18 = vld [vmem:[%s2547_s11 + $0x1c] sm:$0xf] }
  0x1f   : > { %v352_v19 = vld [vmem:[%s2557_s14 + $0x10] sm:$0xf]  ;;  %v353_v20 = vld [vmem:[%s2557_s14 + $0x14] sm:$0xf]  ;;  %v653_v21 = vsel %vm339_vm0, %v362_v17, 0  ;;  %v699_v22 = vsel %vm339_vm0, %v363_v18, 0 }
  0x20   : > { %v354_v23 = vld [vmem:[%s2557_s14 + $0x18] sm:$0xf]  ;;  %v355_v24 = vld [vmem:[%s2557_s14 + $0x1c] sm:$0xf]  ;;  %337 = vst.msk [vmem:[#allocation3 + $0x30] sm:$0xff] %vm322_vm2, %v2427_v0  ;;  %338 = vst.msk [vmem:[#allocation3 + $0x38] sm:$0xff] %vm322_vm2, %v2427_v0 }
  0x21   : > { %v2667_v4 = vld [vmem:[#allocation2] sm:$0xff]  ;;  %v2682_v11 = vld [vmem:[#allocation2 + $0x10] sm:$0xff]  ;;  %s2040_s8 = sshll.u32 %s2417_s21, 7  ;;  %s1868_s14 = scalar_lea.sflag [#allocation6], %s290_s25 }
  0x22   : > { %v369_v52 = vld [vmem:[%s2710_s17 + $0x14] sm:$0xf]  ;;  %s2932_s13 = scalar_lea.hbm %s2984_s5, %s2040_s8  ;;  %s2347_s21 = scalar_lea.vmem %s2934_s10, 128 }
  0x23   : > { %2097 = vmatmul.mubr.msk.bf16.vlgmr.msra.gmra.mrb[0].mxu0 %vm339_vm0, %v348_v7  ;;  %2103 = vmatmul.mubr.msk.bf16.vlgmr.msra.gmra.mrb[0].mxu1 %vm339_vm0, %v349_v8  ;;  %v2672_v7 = vld [vmem:[#allocation2 + $0x8] sm:$0xff]  ;;  %p2348_p12 = scmp.ne.s32.totalorder %s2934_s10, %s2347_s21 }
  0x24   : > { %2107 = vmatpush3.bf16.xpose.msra.mxu0 %v469_v9  ;;  %2113 = vmatpush3.bf16.xpose.msra.mxu1 %v515_v10 }
  0x25   : > { %2108 = vmatprep.mubr.msk.bf16.mxu0 %vm2428_vm1, %v2427_v0  ;;  %2118 = vmatprep.subr.bf16.mxu0 %v2427_v0  ;;  %p2349_p13 = pnand %p2348_p12, %p2502_p4 }
  0x26   : > { %2114 = vmatprep.mubr.msk.bf16.mxu1 %vm2428_vm1, %v2427_v0  ;;  %2124 = vmatprep.subr.bf16.mxu1 %v2427_v0 }
  0x27   : > { %p2350_p0 = pneg %p2349_p13 }
  0x2b   : > { %2109 = vmatmul.mubr.msk.bf16.vlgmr.msra.gmra.mrb[4].mxu0 %vm339_vm0, %v350_v13  ;;  %2115 = vmatmul.mubr.msk.bf16.vlgmr.msra.gmra.mrb[4].mxu1 %vm339_vm0, %v351_v14 }
  0x2c   : > { %2119 = vmatpush3.bf16.xpose.msra.mxu0 %v561_v15  ;;  %2125 = vmatpush3.bf16.xpose.msra.mxu1 %v607_v16  ;;  %v2692_v15 = vld [vmem:[#allocation2 + $0x18] sm:$0xff] }
  0x2d   : > { %2120 = vmatprep.mubr.msk.bf16.mxu0 %vm2428_vm1, %v2427_v0  ;;  %2130 = vmatprep.subr.bf16.mxu0 %v2427_v0 }
  0x2e   : > { %2126 = vmatprep.mubr.msk.bf16.mxu1 %vm2428_vm1, %v2427_v0  ;;  %2136 = vmatprep.subr.bf16.mxu1 %v2427_v0 }
  0x33   : > { %2121 = vmatmul.mubr.msk.bf16.vlgmr.msra.gmra.mrb[8].mxu0 %vm339_vm0, %v352_v19  ;;  %2127 = vmatmul.mubr.msk.bf16.vlgmr.msra.gmra.mrb[8].mxu1 %vm339_vm0, %v353_v20  ;;  %v2702_v19 = vld [vmem:[#allocation2 + $0x20] sm:$0xff]  ;;  %v2704_v20 = vld [vmem:[#allocation2 + $0x28] sm:$0xff] }
  0x34   : > { %2131 = vmatpush3.bf16.xpose.msra.mxu0 %v653_v21  ;;  %2137 = vmatpush3.bf16.xpose.msra.mxu1 %v699_v22  ;;  %v364_v22 = vld [vmem:[%s2710_s17] sm:$0xf] }
  0x35   : > { %2132 = vmatprep.mubr.msk.bf16.mxu0 %vm2428_vm1, %v2427_v0  ;;  %2138 = vmatprep.mubr.msk.bf16.mxu1 %vm2428_vm1, %v2427_v0  ;;  %v996_v25 = vsel %vm994_vm4, %v364_v22, 0 }
  0x36   : > { %2142 = vmatprep.subr.bf16.mxu0 %v2427_v0  ;;  %2148 = vmatprep.subr.bf16.mxu1 %v2427_v0 }
  0x3b   : > { %2133 = vmatmul.mubr.msk.bf16.vlgmr.msra.gmra.mrb[12].mxu0 %vm339_vm0, %v354_v23  ;;  %2139 = vmatmul.mubr.msk.bf16.vlgmr.msra.gmra.mrb[12].mxu1 %vm339_vm0, %v355_v24 }
  0x3c   : > { %2144 = vmatprep.mubr.msk.bf16.mxu0 %vm2428_vm1, %v2427_v0  ;;  %2150 = vmatprep.mubr.msk.bf16.mxu1 %vm2428_vm1, %v2427_v0 }
  0x3d   : > { %2143 = vmatpush3.bf16.msra.mxu0 %v996_v25 }
  0x3e   : > { %2154 = vmatprep.subr.bf16.mxu0 %v2427_v0 }
  0xf6   : > { %v2635_v26 = vpop.f32.mrb[0].mxu0  ;;  %v2637_v27 = vpop.f32.mrb[0].mxu1 }
  0xf7   : > { %v2098_v28 = vpop.f32.mrb[1].mxu0  ;;  %v2104_v29 = vpop.f32.mrb[1].mxu1  ;;  %v750_v30 = vsel %vm749_vm3, %v2635_v26, -inf  ;;  %v753_v35 = vsel %vm749_vm3, %v2637_v27, -inf }
  0xf8   : > { %751 = vmax.xlane.f32.xlu0 %v750_v30  ;;  %v416_v31 = vpop.f32.mrb[2].mxu0  ;;  %v462_v32 = vpop.f32.mrb[2].mxu1 }
  0xf9   : > { %v2099_v33 = vpop.f32.mrb[3].mxu0  ;;  %v2105_v34 = vpop.f32.mrb[3].mxu1  ;;  %v365_v32 = vld [vmem:[%s2710_s17 + $0x4] sm:$0xf] }
  0xfa   : > { %v1042_v33 = vsel %vm994_vm4, %v365_v32, 0  ;;  %v2737_v34 = vld [vmem:[#allocation2 + $0x30] sm:$0xff] }
  0xfb   : > { %2149 = vmatpush3.bf16.msra.mxu1 %v1042_v33 }
  0xfc   : > { %754 = vmax.xlane.f32.xlu0 %v753_v35  ;;  %v2739_v35 = vld [vmem:[#allocation2 + $0x38] sm:$0xff]  ;;  %2160 = vmatprep.subr.bf16.mxu1 %v2427_v0 }
  0xfe   : > { %v2643_v36 = vpop.f32.mrb[4].mxu0  ;;  %v2645_v37 = vpop.f32.mrb[4].mxu1 }
  0xff   : > { %v2110_v38 = vpop.f32.mrb[5].mxu0  ;;  %v756_v39 = vsel %vm749_vm3, %v2643_v36, -inf  ;;  %v2116_v40 = vpop.f32.mrb[5].mxu1  ;;  %v759_v45 = vsel %vm749_vm3, %v2645_v37, -inf }
 0x100   : > { %757 = vmax.xlane.f32.xlu1 %v756_v39  ;;  %v508_v41 = vpop.f32.mrb[6].mxu0  ;;  %v554_v42 = vpop.f32.mrb[6].mxu1  ;;  %v366_v38 = vld [vmem:[%s2710_s17 + $0x8] sm:$0xf] }
 0x101   : > { %v2111_v43 = vpop.f32.mrb[7].mxu0  ;;  %v2117_v44 = vpop.f32.mrb[7].mxu1  ;;  %v1088_v41 = vsel %vm994_vm4, %v366_v38, 0 }
 0x104   : > { %760 = vmax.xlane.f32.xlu1 %v759_v45 }
 0x106   : > { %v2651_v46 = vpop.f32.mrb[8].mxu0  ;;  %v2653_v47 = vpop.f32.mrb[8].mxu1 }
 0x107   : > { %v2122_v48 = vpop.f32.mrb[9].mxu0  ;;  %v762_v49 = vsel %vm749_vm3, %v2651_v46, -inf  ;;  %v2128_v50 = vpop.f32.mrb[9].mxu1  ;;  %v765_v51 = vsel %vm749_vm3, %v2653_v47, -inf }
 0x108   : > { %763 = vmax.xlane.f32.xlu0 %v762_v49  ;;  %v600_v53 = vpop.f32.mrb[10].mxu0  ;;  %v646_v54 = vpop.f32.mrb[10].mxu1  ;;  %766 = vmax.xlane.f32.xlu1 %v765_v51  ;;  %v367_v48 = vld [vmem:[%s2710_s17 + $0xc] sm:$0xf]  ;;  %v368_v50 = vld [vmem:[%s2710_s17 + $0x10] sm:$0xf] }
 0x109   : > { %v2123_v55 = vpop.f32.mrb[11].mxu0  ;;  %v2129_v56 = vpop.f32.mrb[11].mxu1  ;;  %v1134_v49 = vsel %vm994_vm4, %v367_v48, 0  ;;  %v1180_v51 = vsel %vm994_vm4, %v368_v50, 0  ;;  %v2767_v53 = vsel %vm994_vm4, %v369_v52, 0 }
 0x10a   : > { %v370_v54 = vld [vmem:[%s2710_s17 + $0x18] sm:$0xf]  ;;  %v371_v56 = vld [vmem:[%s2710_s17 + $0x1c] sm:$0xf]  ;;  %s2353_s17 = scalar_lea.vmem %s2352_s16, 256 }
 0x10b   : > { %v2771_v55 = vsel %vm994_vm4, %v370_v54, 0  ;;  %p2355_p2 = scmp.lt.s32.totalorder %s2353_s17, %s2347_s21 }
 0x10d   : > { %p2356_p3 = por %p2355_p2, %p2354_p1 }
 0x10e   : > { %v2659_v57 = vpop.f32.mrb[12].mxu0  ;;  %v2661_v58 = vpop.f32.mrb[12].mxu1 }
 0x10f   : > { %v2134_v59 = vpop.f32.mrb[13].mxu0  ;;  %v768_v60 = vsel %vm749_vm3, %v2659_v57, -inf  ;;  %v2140_v61 = vpop.f32.mrb[13].mxu1  ;;  %v771_v62 = vsel %vm749_vm3, %v2661_v58, -inf  ;;  %p2357_p5 = pnand %p2356_p3, %p2350_p0 }
 0x110   : > { %769 = vmax.xlane.f32.xlu0 %v768_v60  ;;  %v692_v63 = vpop.f32.mrb[14].mxu0  ;;  %v738_v1 = vpop.f32.mrb[14].mxu1  ;;  %772 = vmax.xlane.f32.xlu1 %v771_v62  ;;  %v2775_v59 = vsel %vm994_vm4, %v371_v56, 0 }
 0x111   : > { %v2135_v2 = vpop.f32.mrb[15].mxu0  ;;  %v2141_v3 = vpop.f32.mrb[15].mxu1 }
 0x185   : > { %v752_v5 = vpop.xlane.xlu0 %751 }
 0x186   : > { %v2670_v6 = vmax.f32 %v2667_v4, %v752_v5 }
 0x188   : > { %v782_v8 = vsub.f32 %v2667_v4, %v2670_v6  ;;  %1376 = vst.msk [vmem:[#allocation2] sm:$0xff] %vm322_vm2, %v2670_v6  ;;  %808 = vperm.xlu0 %2297, %v2670_v6  }
 0x189   : > { %v755_v9 = vpop.xlane.xlu0 %754 }
 0x18a   : > { %v2680_v10 = vmax.f32 %v2672_v7, %v755_v9 }
 0x18c   : > { %v783_v12 = vsub.f32 %v2672_v7, %v2680_v10  ;;  %1377 = vst.msk [vmem:[#allocation2 + $0x8] sm:$0xff] %vm322_vm2, %v2680_v10  ;;  %813 = vperm.xlu1 %2298, %v2680_v10   ;;  %v870_v7 = vld [vmem:[#allocation3] sm:$0xff] }
 0x18d   : > { %v758_v13 = vpop.xlane.xlu1 %757 }
 0x18e   : > { %v2690_v14 = vmax.f32 %v2682_v11, %v758_v13 }
 0x190   : > { %v784_v16 = vsub.f32 %v2682_v11, %v2690_v14  ;;  %1378 = vst.msk [vmem:[#allocation2 + $0x10] sm:$0xff] %vm322_vm2, %v2690_v14  ;;  %818 = vperm.xlu1 %2298, %v2690_v14   ;;  %v871_v14 = vld [vmem:[#allocation3 + $0x8] sm:$0xff] }
 0x191   : > { %v761_v17 = vpop.xlane.xlu1 %760 }
 0x192   : > { %v2700_v18 = vmax.f32 %v2692_v15, %v761_v17 }
 0x194   : > { %v785_v21 = vsub.f32 %v2692_v15, %v2700_v18  ;;  %1379 = vst.msk [vmem:[#allocation2 + $0x18] sm:$0xff] %vm322_vm2, %v2700_v18  ;;  %823 = vperm.xlu1 %2298, %v2700_v18  }
 0x195   : > { %v764_v23 = vpop.xlane.xlu0 %763  ;;  %v767_v24 = vpop.xlane.xlu1 %766 }
 0x196   : > { %v2720_v28 = vmax.f32 %v2702_v19, %v764_v23  ;;  %v2723_v29 = vmax.f32 %v2704_v20, %v767_v24 }
 0x198   : > { %v786_v30 = vsub.f32 %v2702_v19, %v2720_v28  ;;  %1380 = vst.msk [vmem:[#allocation2 + $0x20] sm:$0xff] %vm322_vm2, %v2720_v28  ;;  %828 = vperm.xlu1 %2298, %v2720_v28   ;;  %v787_v31 = vsub.f32 %v2704_v20, %v2723_v29  ;;  %1381 = vst.msk [vmem:[#allocation2 + $0x28] sm:$0xff] %vm322_vm2, %v2723_v29 }
 0x19a   : > { %v798_v10 = vmul.f32 1.442695, %v786_v30 }
 0x19c   : > { %833 = vperm.xlu1 %2298, %v2723_v29  }
 0x19d   : > { %v770_v39 = vpop.xlane.xlu0 %769  ;;  %v773_v40 = vpop.xlane.xlu1 %772 }
 0x19e   : > { %v2746_v42 = vmax.f32 %v2737_v34, %v770_v39  ;;  %v2749_v43 = vmax.f32 %v2739_v35, %v773_v40 }
 0x1a0   : > { %v788_v44 = vsub.f32 %v2737_v34, %v2746_v42  ;;  %1382 = vst.msk [vmem:[#allocation2 + $0x30] sm:$0xff] %vm322_vm2, %v2746_v42  ;;  %838 = vperm.xlu1 %2298, %v2746_v42   ;;  %v789_v45 = vsub.f32 %v2739_v35, %v2749_v43  ;;  %1383 = vst.msk [vmem:[#allocation2 + $0x38] sm:$0xff] %vm322_vm2, %v2749_v43  ;;  %v874_v34 = vld [vmem:[#allocation3 + $0x20] sm:$0xff] }
 0x1a2   : > { %v802_v19 = vmul.f32 1.442695, %v788_v44  ;;  %v804_v20 = vmul.f32 1.442695, %v789_v45 }
 0x1a4   : > { %843 = vperm.xlu1 %2298, %v2749_v43  }
 0x207   : > { %v809_v60 = vpop.permute.xlu0 %808 }
 0x208   : > { %v846_v61 = vsub.f32 %v2635_v26, %v809_v60 }
 0x20a   : > { %v854_v62 = vmul.f32 1.442695, %v846_v61 }
 0x20b   : > { %v814_v63 = vpop.permute.xlu1 %813 }
 0x20c   : > { %2299 = vpow2.f32 %v854_v62  ;;  %v847_v1 = vsub.f32 %v2637_v27, %v814_v63 }
 0x20e   : > { %v856_v2 = vmul.f32 1.442695, %v847_v1 }
 0x20f   : > { %v819_v3 = vpop.permute.xlu1 %818 }
 0x210   : > { %2301 = vpow2.f32 %v856_v2  ;;  %v848_v5 = vsub.f32 %v2643_v36, %v819_v3 }
 0x212   : > { %v858_v9 = vmul.f32 1.442695, %v848_v5 }
 0x213   : > { %v824_v13 = vpop.permute.xlu1 %823 }
 0x214   : > { %2303 = vpow2.f32 %v858_v9  ;;  %v849_v17 = vsub.f32 %v2645_v37, %v824_v13 }
 0x216   : > { %v2300_v22 = vpop.eup %2299  ;;  %v860_v23 = vmul.f32 1.442695, %v849_v17  ;;  %v792_v17 = vmul.f32 1.442695, %v783_v12 }
 0x217   : > { %v829_v24 = vpop.permute.xlu1 %828  ;;  %v886_v26 = vsel %vm749_vm3, %v2300_v22, 0.0  ;;  %v983_v25 = vpack.c.bf16 %v2300_v22, %v2300_v22  ;;  %v794_v22 = vmul.f32 1.442695, %v784_v16  ;;  %v800_v16 = vmul.f32 1.442695, %v787_v31 }
 0x218   : > { %2305 = vpow2.f32 %v860_v23  ;;  %v850_v32 = vsub.f32 %v2651_v46, %v829_v24  ;;  %887 = vadd.xlane.f32.xlu0 %v886_v26  ;;  %v796_v23 = vmul.f32 1.442695, %v785_v21  ;;  %v872_v26 = vld [vmem:[#allocation3 + $0x10] sm:$0xff] }
 0x219   : > { %2145 = vmatmul.mubr.msk.bf16.vlgmr.msra.gmra.mrb[16].mxu0 %vm749_vm3, %v983_v25 }
 0x21a   : > { %v2302_v27 = vpop.eup %2301  ;;  %v862_v33 = vmul.f32 1.442695, %v850_v32  ;;  %2155 = vmatpush3.bf16.msra.mxu0 %v1088_v41  ;;  %2156 = vmatprep.mubr.msk.bf16.mxu0 %vm2428_vm1, %v2427_v0  ;;  %v873_v32 = vld [vmem:[#allocation3 + $0x18] sm:$0xff] }
 0x21b   : > { %v834_v36 = vpop.permute.xlu1 %833  ;;  %v889_v37 = vsel %vm749_vm3, %v2302_v27, 0.0  ;;  %v984_v38 = vpack.c.bf16 %v2302_v27, %v2302_v27  ;;  %2166 = vmatprep.subr.bf16.mxu0 %v2427_v0 }
 0x21c   : > { %2307 = vpow2.f32 %v862_v33  ;;  %v851_v39 = vsub.f32 %v2653_v47, %v834_v36  ;;  %890 = vadd.xlane.f32.xlu1 %v889_v37 }
 0x21d   : > { %2151 = vmatmul.mubr.msk.bf16.vlgmr.msra.gmra.mrb[16].mxu1 %vm749_vm3, %v984_v38 }
 0x21e   : > { %v2304_v46 = vpop.eup %2303  ;;  %v864_v40 = vmul.f32 1.442695, %v851_v39  ;;  %2161 = vmatpush3.bf16.msra.mxu1 %v1134_v49  ;;  %2162 = vmatprep.mubr.msk.bf16.mxu1 %vm2428_vm1, %v2427_v0 }
 0x21f   : > { %v839_v41 = vpop.permute.xlu1 %838  ;;  %v892_v48 = vsel %vm749_vm3, %v2304_v46, 0.0  ;;  %v985_v50 = vpack.c.bf16 %v2304_v46, %v2304_v46  ;;  %2172 = vmatprep.subr.bf16.mxu1 %v2427_v0  ;;  %v875_v46 = vld [vmem:[#allocation3 + $0x28] sm:$0xff] }
 0x220   : > { %2309 = vpow2.f32 %v864_v40  ;;  %v852_v52 = vsub.f32 %v2659_v57, %v839_v41  ;;  %893 = vadd.xlane.f32.xlu0 %v892_v48  ;;  %v876_v48 = vld [vmem:[#allocation3 + $0x30] sm:$0xff] }
 0x221   : > { %2157 = vmatmul.mubr.msk.bf16.vlgmr.msra.gmra.mrb[20].mxu0 %vm749_vm3, %v985_v50 }
 0x222   : > { %v2306_v47 = vpop.eup %2305  ;;  %v866_v54 = vmul.f32 1.442695, %v852_v52  ;;  %2167 = vmatpush3.bf16.msra.mxu0 %v1180_v51  ;;  %2168 = vmatprep.mubr.msk.bf16.mxu0 %vm2428_vm1, %v2427_v0 }
 0x223   : > { %v844_v49 = vpop.permute.xlu1 %843  ;;  %v895_v56 = vsel %vm749_vm3, %v2306_v47, 0.0  ;;  %v986_v60 = vpack.c.bf16 %v2306_v47, %v2306_v47  ;;  %2178 = vmatprep.subr.bf16.mxu0 %v2427_v0  ;;  %v1467_v47 = vld [vmem:[%s2982_s3] sm:$0x3] }
 0x224   : > { %2311 = vpow2.f32 %v866_v54  ;;  %v853_v61 = vsub.f32 %v2661_v58, %v844_v49  ;;  %896 = vadd.xlane.f32.xlu1 %v895_v56  ;;  %v1521_v49 = vsel %vm1473_vm5, %v1467_v47, 0 }
 0x225   : > { %2163 = vmatmul.mubr.msk.bf16.vlgmr.msra.gmra.mrb[20].mxu1 %vm749_vm3, %v986_v60 }
 0x226   : > { %v2308_v57 = vpop.eup %2307  ;;  %v868_v62 = vmul.f32 1.442695, %v853_v61  ;;  %2173 = vmatpush3.bf16.msra.mxu1 %v2767_v53  ;;  %2174 = vmatprep.mubr.msk.bf16.mxu1 %vm2428_vm1, %v2427_v0 }
 0x227   : > { %v898_v51 = vsel %vm749_vm3, %v2308_v57, 0.0  ;;  %v987_v63 = vpack.c.bf16 %v2308_v57, %v2308_v57  ;;  %2184 = vmatprep.subr.bf16.mxu1 %v2427_v0  ;;  %v877_v57 = vld [vmem:[#allocation3 + $0x38] sm:$0xff] }
 0x228   : > { %2313 = vpow2.f32 %v868_v62  ;;  %899 = vadd.xlane.f32.xlu0 %v898_v51  ;;  %v2023_v62 = vld [vmem:[%s2982_s3 + $0x2] sm:$0x3] }
 0x229   : > { %2169 = vmatmul.mubr.msk.bf16.vlgmr.msra.gmra.mrb[24].mxu0 %vm749_vm3, %v987_v63 }
 0x22a   : > { %v2310_v58 = vpop.eup %2309  ;;  %2179 = vmatpush3.bf16.msra.mxu0 %v2771_v55  ;;  %2180 = vmatprep.mubr.msk.bf16.mxu0 %vm2428_vm1, %v2427_v0 }
 0x22b   : > { %v901_v53 = vsel %vm749_vm3, %v2310_v58, 0.0  ;;  %v988_v1 = vpack.c.bf16 %v2310_v58, %v2310_v58  ;;  %2190 = vmatprep.subr.bf16.mxu0 %v2427_v0  ;;  %v1475_v58 = vsel %vm1473_vm5, %v2023_v62, 0 }
 0x22c   : > { %902 = vadd.xlane.f32.xlu1 %v901_v53 }
 0x22d   : > { %2175 = vmatmul.mubr.msk.bf16.vlgmr.msra.gmra.mrb[24].mxu1 %vm749_vm3, %v988_v1 }
 0x22e   : > { %v2312_v2 = vpop.eup %2311  ;;  %2185 = vmatpush3.bf16.msra.mxu1 %v2775_v59  ;;  %2186 = vmatprep.mubr.msk.bf16.mxu1 %vm2428_vm1, %v2427_v0  ;;  %v790_v59 = vmul.f32 1.442695, %v782_v8 }
 0x22f   : > { %v904_v3 = vsel %vm749_vm3, %v2312_v2, 0.0  ;;  %v989_v55 = vpack.c.bf16 %v2312_v2, %v2312_v2  ;;  %2196 = vmatprep.subr.bf16.mxu1 %v2427_v0 }
 0x230   : > { %905 = vadd.xlane.f32.xlu0 %v904_v3  ;;  %2315 = vpow2.f32 %v790_v59 }
 0x231   : > { %2181 = vmatmul.mubr.msk.bf16.vlgmr.msra.gmra.mrb[28].mxu0 %vm749_vm3, %v989_v55  ;;  %2317 = vpow2.f32 %v792_v17 }
 0x232   : > { %v2314_v5 = vpop.eup %2313  ;;  %2192 = vmatprep.mubr.msk.bf16.mxu0 %vm2428_vm1, %v2427_v0  ;;  %2319 = vpow2.f32 %v794_v22  ;;  %2191 = vmatpush3.bf16.msra.mxu0 %v1475_v58 }
 0x233   : > { %v907_v9 = vsel %vm749_vm3, %v2314_v5, 0.0  ;;  %v990_v13 = vpack.c.bf16 %v2314_v5, %v2314_v5  ;;  %2321 = vpow2.f32 %v796_v23  ;;  %2202 = vmatprep.subr.bf16.mxu0 %v2427_v0 }
 0x234   : > { %908 = vadd.xlane.f32.xlu1 %v907_v9  ;;  %2323 = vpow2.f32 %v798_v10 }
 0x235   : > { %2187 = vmatmul.mubr.msk.bf16.vlgmr.msra.gmra.mrb[28].mxu1 %vm749_vm3, %v990_v13  ;;  %2325 = vpow2.f32 %v800_v16 }
 0x236   : > { %2198 = vmatprep.mubr.msk.bf16.mxu1 %vm2428_vm1, %v2427_v0  ;;  %2327 = vpow2.f32 %v802_v19  ;;  %2197 = vmatpush3.bf16.msra.mxu1 %v1521_v49 }
 0x237   : > { %2208 = vmatprep.subr.bf16.mxu1 %v2427_v0 }
 0x23a   : > { %v2316_v4 = vpop.eup %2315 }
 0x23b   : > { %v2318_v6 = vpop.eup %2317  ;;  %v878_v11 = vmul.f32 %v2316_v4, %v870_v7  ;;  %v928_v7 = vld [vmem:[#allocation4 + $0x8] sm:$0xff] }
 0x23c   : > { %v2320_v8 = vpop.eup %2319  ;;  %v879_v18 = vmul.f32 %v2318_v6, %v871_v14 }
 0x23d   : > { %v2322_v24 = vpop.eup %2321  ;;  %v880_v28 = vmul.f32 %v2320_v8, %v872_v26 }
 0x23e   : > { %v881_v31 = vmul.f32 %v2322_v24, %v873_v32  ;;  %v2324_v33 = vpop.eup %2323 }
 0x23f   : > { %v882_v37 = vmul.f32 %v2324_v33, %v874_v34  ;;  %v2326_v38 = vpop.eup %2325 }
 0x240   : > { %v883_v43 = vmul.f32 %v2326_v38, %v875_v46  ;;  %v2328_v40 = vpop.eup %2327 }
 0x241   : > { %v884_v56 = vmul.f32 %v2328_v40, %v876_v48 }
 0x245   : > { %937 = vperm.xlu1 %2298, %v2316_v4  }
 0x246   : > { %942 = vperm.xlu0 %2297, %v2318_v6   ;;  %v927_v6 = vld [vmem:[#allocation4] sm:$0xff] }
 0x249   : > { %947 = vperm.xlu1 %2298, %v2320_v8  }
 0x24a   : > { %952 = vperm.xlu0 %2297, %v2322_v24  }
 0x2a5   : > { %v888_v12 = vpop.xlane.xlu0 %887 }
 0x2a6   : > { %v910_v15 = vadd.f32 %v888_v12, %v878_v11 }
 0x2a8   : > { %919 = vst.msk [vmem:[#allocation3] sm:$0xff] %vm322_vm2, %v910_v15 }
 0x2a9   : > { %v891_v21 = vpop.xlane.xlu1 %890 }
 0x2aa   : > { %v911_v25 = vadd.f32 %v891_v21, %v879_v18  ;;  %v929_v21 = vld [vmem:[#allocation4 + $0x10] sm:$0xff] }
 0x2ac   : > { %920 = vst.msk [vmem:[#allocation3 + $0x8] sm:$0xff] %vm322_vm2, %v911_v25 }
 0x2ad   : > { %v894_v30 = vpop.xlane.xlu0 %893 }
 0x2ae   : > { %v912_v27 = vadd.f32 %v894_v30, %v880_v28 }
 0x2af   : > { %v1395_v29 = vld [vmem:[#allocation3] sm:$0xff] }
 0x2b0   : > { %921 = vst.msk [vmem:[#allocation3 + $0x10] sm:$0xff] %vm322_vm2, %v912_v27  ;;  %2329 = vrcp.f32 %v1395_v29 }
 0x2b1   : > { %v897_v36 = vpop.xlane.xlu1 %896  ;;  %2331 = vpow2.f32 %v804_v20  ;;  %v930_v20 = vld [vmem:[#allocation4 + $0x18] sm:$0xff] }
 0x2b2   : > { %v913_v42 = vadd.f32 %v897_v36, %v881_v31 }
 0x2b3   : > { %v1396_v44 = vld [vmem:[#allocation3 + $0x8] sm:$0xff] }
 0x2b4   : > { %922 = vst.msk [vmem:[#allocation3 + $0x18] sm:$0xff] %vm322_vm2, %v913_v42  ;;  %2333 = vrcp.f32 %v1396_v44 }
 0x2b5   : > { %v900_v39 = vpop.xlane.xlu0 %899 }
 0x2b6   : > { %v914_v35 = vadd.f32 %v900_v39, %v882_v37 }
 0x2b7   : > { %v1397_v45 = vld [vmem:[#allocation3 + $0x10] sm:$0xff] }
 0x2b8   : > { %923 = vst.msk [vmem:[#allocation3 + $0x20] sm:$0xff] %vm322_vm2, %v914_v35  ;;  %2335 = vrcp.f32 %v1397_v45 }
 0x2b9   : > { %v903_v41 = vpop.xlane.xlu1 %902 }
 0x2ba   : > { %v2330_v50 = vpop.eup %2329  ;;  %v915_v52 = vadd.f32 %v903_v41, %v883_v43 }
 0x2bb   : > { %1413 = vperm.xlu0 %2297, %v2330_v50   ;;  %v1398_v54 = vld [vmem:[#allocation3 + $0x18] sm:$0xff]  ;;  %v2332_v60 = vpop.eup %2331 }
 0x2bc   : > { %924 = vst.msk [vmem:[#allocation3 + $0x28] sm:$0xff] %vm322_vm2, %v915_v52  ;;  %2337 = vrcp.f32 %v1398_v54  ;;  %v885_v53 = vmul.f32 %v2332_v60, %v877_v57 }
 0x2bd   : > { %v906_v61 = vpop.xlane.xlu0 %905 }
 0x2be   : > { %v2334_v51 = vpop.eup %2333  ;;  %v916_v63 = vadd.f32 %v906_v61, %v884_v56 }
 0x2bf   : > { %1418 = vperm.xlu1 %2298, %v2334_v51   ;;  %962 = vperm.xlu0 %2297, %v2326_v38   ;;  %v1399_v1 = vld [vmem:[#allocation3 + $0x20] sm:$0xff] }
 0x2c0   : > { %925 = vst.msk [vmem:[#allocation3 + $0x30] sm:$0xff] %vm322_vm2, %v916_v63  ;;  %2339 = vrcp.f32 %v1399_v1 }
 0x2c1   : > { %v909_v2 = vpop.xlane.xlu1 %908 }
 0x2c2   : > { %v917_v3 = vadd.f32 %v909_v2, %v885_v53  ;;  %v2336_v5 = vpop.eup %2335  ;;  %v2028_v53 = vld [vmem:[%s2982_s3 + $0x6] sm:$0x3]  ;;  %v932_v2 = vld [vmem:[#allocation4 + $0x28] sm:$0xff] }
 0x2c3   : > { %957 = vperm.xlu1 %2298, %v2324_v33   ;;  %v1400_v55 = vld [vmem:[#allocation3 + $0x28] sm:$0xff] }
 0x2c4   : > { %926 = vst.msk [vmem:[#allocation3 + $0x38] sm:$0xff] %vm322_vm2, %v917_v3  ;;  %2341 = vrcp.f32 %v1400_v55  ;;  %v1618_v55 = vsel %vm1473_vm5, %v2028_v53, 0 }
 0x2c5   : > { %v938_v8 = vpop.permute.xlu1 %937  ;;  %v943_v10 = vpop.permute.xlu0 %942 }
 0x2c6   : > { %v2338_v9 = vpop.eup %2337  ;;  %v975_v24 = vmul.f32 %v938_v8, %v927_v6  ;;  %v976_v16 = vmul.f32 %v943_v10, %v928_v7 }
 0x2c7   : > { %1428 = vperm.xlu0 %2297, %v2338_v9   ;;  %1423 = vperm.xlu1 %2298, %v2336_v5   ;;  %v1401_v13 = vld [vmem:[#allocation3 + $0x30] sm:$0xff] }
 0x2c8   : > { %2343 = vrcp.f32 %v1401_v13 }
 0x2c9   : > { %v948_v26 = vpop.permute.xlu1 %947  ;;  %v953_v29 = vpop.permute.xlu0 %952 }
 0x2ca   : > { %v2340_v17 = vpop.eup %2339  ;;  %v977_v32 = vmul.f32 %v948_v26, %v929_v21  ;;  %v978_v42 = vmul.f32 %v953_v29, %v930_v20 }
 0x2cb   : > { %972 = vperm.xlu0 %2297, %v2332_v60   ;;  %967 = vperm.xlu1 %2298, %v2328_v40   ;;  %v1402_v59 = vld [vmem:[#allocation3 + $0x38] sm:$0xff] }
 0x2cc   : > { %2345 = vrcp.f32 %v1402_v59  ;;  %v2026_v59 = vld [vmem:[%s2982_s3 + $0x4] sm:$0x3] }
 0x2cd   : > { %v1569_v8 = vsel %vm1473_vm5, %v2026_v59, 0 }
 0x2ce   : > { %v2342_v22 = vpop.eup %2341 }
 0x2cf   : > { %1438 = vperm.xlu0 %2297, %v2342_v22   ;;  %1433 = vperm.xlu1 %2298, %v2340_v17  }
 0x2d2   : > { %v2344_v23 = vpop.eup %2343 }
 0x2d3   : > { %1443 = vperm.xlu1 %2298, %v2344_v23   ;;  %v931_v23 = vld [vmem:[#allocation4 + $0x20] sm:$0xff] }
 0x2d6   : > { %v2346_v4 = vpop.eup %2345 }
 0x2d7   : > { %1448 = vperm.xlu0 %2297, %v2346_v4  }
 0x2ec   : > { %v1032_v11 = vpop.f32.mrb[16].mxu0 }
 0x2ed   : > { %v1360_v12 = vadd.f32 %v1032_v11, %v975_v24  ;;  %v2146_v14 = vpop.f32.mrb[17].mxu0  ;;  %v2030_v11 = vld [vmem:[%s2982_s3 + $0x8] sm:$0x3] }
 0x2ee   : > { %v1035_v15 = vpop.f32.mrb[18].mxu0 }
 0x2ef   : > { %1368 = vst.msk [vmem:[#allocation4] sm:$0xff] %vm339_vm0, %v1360_v12  ;;  %v2147_v18 = vpop.f32.mrb[19].mxu0 }
 0x2f0   : > { %v1078_v25 = vpop.f32.mrb[16].mxu1  ;;  %v2032_v18 = vld [vmem:[%s2982_s3 + $0xa] sm:$0x3] }
 0x2f1   : > { %v1361_v19 = vadd.f32 %v1078_v25, %v976_v16  ;;  %v2152_v28 = vpop.f32.mrb[17].mxu1  ;;  %v933_v25 = vld [vmem:[#allocation4 + $0x30] sm:$0xff] }
 0x2f2   : > { %v1081_v30 = vpop.f32.mrb[18].mxu1 }
 0x2f3   : > { %1369 = vst.msk [vmem:[#allocation4 + $0x8] sm:$0xff] %vm339_vm0, %v1361_v19  ;;  %v2153_v27 = vpop.f32.mrb[19].mxu1  ;;  %v934_v19 = vld [vmem:[#allocation4 + $0x38] sm:$0xff] }
 0x2f4   : > { %v1124_v31 = vpop.f32.mrb[20].mxu0  ;;  %v1716_v27 = vsel %vm1473_vm5, %v2032_v18, 0 }
 0x2f5   : > { %v1362_v33 = vadd.f32 %v1124_v31, %v977_v32  ;;  %v2158_v36 = vpop.f32.mrb[21].mxu0  ;;  %v1667_v32 = vsel %vm1473_vm5, %v2030_v11, 0 }
 0x2f6   : > { %v1127_v34 = vpop.f32.mrb[22].mxu0  ;;  %v1387_v58 = vld [vmem:[#allocation4] sm:$0xff] }
 0x2f7   : > { %1370 = vst.msk [vmem:[#allocation4 + $0x10] sm:$0xff] %vm339_vm0, %v1362_v33  ;;  %v2159_v44 = vpop.f32.mrb[23].mxu0 }
 0x2f8   : > { %v1170_v37 = vpop.f32.mrb[20].mxu1 }
 0x2f9   : > { %v1363_v38 = vadd.f32 %v1170_v37, %v978_v42  ;;  %v2164_v39 = vpop.f32.mrb[21].mxu1  ;;  %v2034_v42 = vld [vmem:[%s2982_s3 + $0xc] sm:$0x3] }
 0x2fa   : > { %v1173_v46 = vpop.f32.mrb[22].mxu1  ;;  %v1388_v9 = vld [vmem:[#allocation4 + $0x8] sm:$0xff] }
 0x2fb   : > { %1371 = vst.msk [vmem:[#allocation4 + $0x18] sm:$0xff] %vm339_vm0, %v1363_v38  ;;  %v2165_v35 = vpop.f32.mrb[23].mxu1  ;;  %v2036_v46 = vld [vmem:[%s2982_s3 + $0xe] sm:$0x3] }
 0x2fc   : > { %v1216_v43 = vpop.f32.mrb[24].mxu0 }
 0x2fd   : > { %v2170_v45 = vpop.f32.mrb[25].mxu0 }
 0x2fe   : > { %v1219_v40 = vpop.f32.mrb[26].mxu0  ;;  %v1389_v14 = vld [vmem:[#allocation4 + $0x10] sm:$0xff] }
 0x2ff   : > { %v2171_v41 = vpop.f32.mrb[27].mxu0 }
 0x300   : > { %v1262_v48 = vpop.f32.mrb[24].mxu1  ;;  %v1765_v41 = vsel %vm1473_vm5, %v2034_v42, 0 }
 0x301   : > { %v2176_v50 = vpop.f32.mrb[25].mxu1 }
 0x302   : > { %v1265_v52 = vpop.f32.mrb[26].mxu1  ;;  %v1390_v15 = vld [vmem:[#allocation4 + $0x18] sm:$0xff] }
 0x303   : > { %v2177_v47 = vpop.f32.mrb[27].mxu1 }
 0x304   : > { %v1308_v54 = vpop.f32.mrb[28].mxu0 }
 0x305   : > { %v2182_v49 = vpop.f32.mrb[29].mxu0 }
 0x306   : > { %v1311_v56 = vpop.f32.mrb[30].mxu0 }
 0x307   : > { %v2183_v60 = vpop.f32.mrb[31].mxu0 }
 0x308   : > { %v1354_v61 = vpop.f32.mrb[28].mxu1 }
 0x309   : > { %v2188_v57 = vpop.f32.mrb[29].mxu1 }
 0x30a   : > { %v1357_v62 = vpop.f32.mrb[30].mxu1 }
 0x30b   : > { %v2189_v51 = vpop.f32.mrb[31].mxu1 }
 0x33a   : > { %v1414_v63 = vpop.permute.xlu0 %1413 }
 0x33b   : > { %v1451_v1 = vmul.f32 %v1414_v63, %v1387_v58 }
 0x33d   : > { %v1459_v3 = vpack.c.bf16 %v1451_v1, %v1451_v1 }
 0x33e   : > { %v1419_v5 = vpop.permute.xlu1 %1418  ;;  %v963_v13 = vpop.permute.xlu0 %962 }
 0x33f   : > { %v1452_v17 = vmul.f32 %v1419_v5, %v1388_v9  ;;  %v980_v22 = vmul.f32 %v963_v13, %v932_v2  ;;  %2199 = vmatmul.mubr.msk.bf16.vlgmr.msra.gmra.mrb[32].mxu1 %vm339_vm0, %v1459_v3 }
 0x340   : > { %2209 = vmatpush3.bf16.msra.mxu1 %v1618_v55  ;;  %2210 = vmatprep.mubr.msk.bf16.mxu1 %vm2428_vm1, %v2427_v0 }
 0x341   : > { %v1460_v4 = vpack.c.bf16 %v1452_v17, %v1452_v17  ;;  %v1365_v6 = vadd.f32 %v1262_v48, %v980_v22  ;;  %2220 = vmatprep.subr.bf16.mxu1 %v2427_v0  ;;  %v1814_v48 = vsel %vm1473_vm5, %v2036_v46, 0 }
 0x342   : > { %v958_v24 = vpop.permute.xlu1 %957 }
 0x343   : > { %1373 = vst.msk [vmem:[#allocation4 + $0x28] sm:$0xff] %vm339_vm0, %v1365_v6  ;;  %v979_v7 = vmul.f32 %v958_v24, %v931_v23  ;;  %2193 = vmatmul.mubr.msk.bf16.vlgmr.msra.gmra.mrb[32].mxu0 %vm339_vm0, %v1460_v4 }
 0x344   : > { %2203 = vmatpush3.bf16.msra.mxu0 %v1569_v8  ;;  %2204 = vmatprep.mubr.msk.bf16.mxu0 %vm2428_vm1, %v2427_v0 }
 0x345   : > { %v1364_v10 = vadd.f32 %v1216_v43, %v979_v7  ;;  %2214 = vmatprep.subr.bf16.mxu0 %v2427_v0 }
 0x346   : > { %v1424_v12 = vpop.permute.xlu1 %1423  ;;  %v1429_v16 = vpop.permute.xlu0 %1428 }
 0x347   : > { %1372 = vst.msk [vmem:[#allocation4 + $0x20] sm:$0xff] %vm339_vm0, %v1364_v10  ;;  %v1453_v21 = vmul.f32 %v1424_v12, %v1389_v14  ;;  %v1454_v26 = vmul.f32 %v1429_v16, %v1390_v15 }
 0x349   : > { %v1461_v28 = vpack.c.bf16 %v1453_v21, %v1453_v21  ;;  %v1462_v30 = vpack.c.bf16 %v1454_v26, %v1454_v26 }
 0x34a   : > { %v968_v20 = vpop.permute.xlu1 %967  ;;  %v973_v29 = vpop.permute.xlu0 %972  ;;  %v1392_v38 = vld [vmem:[#allocation4 + $0x28] sm:$0xff] }
 0x34b   : > { %v981_v31 = vmul.f32 %v968_v20, %v933_v25  ;;  %v982_v33 = vmul.f32 %v973_v29, %v934_v19  ;;  %2205 = vmatmul.mubr.msk.bf16.vlgmr.msra.gmra.mrb[36].mxu0 %vm339_vm0, %v1461_v28  ;;  %2211 = vmatmul.mubr.msk.bf16.vlgmr.msra.gmra.mrb[36].mxu1 %vm339_vm0, %v1462_v30  ;;  %v2038_v28 = vld [vmem:[%s2983_s4] ss:$0 sm:$0xff] }
 0x34c   : > { %2215 = vmatpush3.bf16.msra.mxu0 %v1667_v32  ;;  %2221 = vmatpush3.bf16.msra.mxu1 %v1716_v27 }
 0x34d   : > { %v1366_v36 = vadd.f32 %v1308_v54, %v981_v31  ;;  %v1367_v34 = vadd.f32 %v1354_v61, %v982_v33  ;;  %2216 = vmatprep.mubr.msk.bf16.mxu0 %vm2428_vm1, %v2427_v0  ;;  %2222 = vmatprep.mubr.msk.bf16.mxu1 %vm2428_vm1, %v2427_v0 }
 0x34e   : > { %v1434_v44 = vpop.permute.xlu1 %1433  ;;  %v1391_v37 = vld [vmem:[#allocation4 + $0x20] sm:$0xff]  ;;  %v1439_v39 = vpop.permute.xlu0 %1438  ;;  %2226 = vmatprep.subr.bf16.mxu0 %v2427_v0  ;;  %2232 = vmatprep.subr.bf16.mxu1 %v2427_v0 }
 0x34f   : > { %1374 = vst.msk [vmem:[#allocation4 + $0x30] sm:$0xff] %vm339_vm0, %v1366_v36  ;;  %1375 = vst.msk [vmem:[#allocation4 + $0x38] sm:$0xff] %vm339_vm0, %v1367_v34  ;;  %v1455_v35 = vmul.f32 %v1434_v44, %v1391_v37  ;;  %v1456_v43 = vmul.f32 %v1439_v39, %v1392_v38 }
 0x351   : > { %v1463_v45 = vpack.c.bf16 %v1455_v35, %v1455_v35  ;;  %v1464_v40 = vpack.c.bf16 %v1456_v43, %v1456_v43 }
 0x352   : > { %v1444_v50 = vpop.permute.xlu1 %1443 }
 0x353   : > { %2217 = vmatmul.mubr.msk.bf16.vlgmr.msra.gmra.mrb[40].mxu0 %vm339_vm0, %v1463_v45  ;;  %2223 = vmatmul.mubr.msk.bf16.vlgmr.msra.gmra.mrb[40].mxu1 %vm339_vm0, %v1464_v40 }
 0x354   : > { %2227 = vmatpush3.bf16.msra.mxu0 %v1765_v41  ;;  %2233 = vmatpush3.bf16.msra.mxu1 %v1814_v48 }
 0x355   : > { %2228 = vmatprep.mubr.msk.bf16.mxu0 %vm2428_vm1, %v2427_v0  ;;  %2234 = vmatprep.mubr.msk.bf16.mxu1 %vm2428_vm1, %v2427_v0 }
 0x356   : > { %v1393_v52 = vld [vmem:[#allocation4 + $0x30] sm:$0xff]  ;;  %v1394_v47 = vld [vmem:[#allocation4 + $0x38] sm:$0xff]  ;;  %v1449_v54 = vpop.permute.xlu0 %1448 }
 0x357   : > { %v1457_v49 = vmul.f32 %v1444_v50, %v1393_v52  ;;  %v1458_v56 = vmul.f32 %v1449_v54, %v1394_v47 }
 0x359   : > { %v1465_v60 = vpack.c.bf16 %v1457_v49, %v1457_v49  ;;  %v1466_v61 = vpack.c.bf16 %v1458_v56, %v1458_v56 }
 0x35b   : > { %2229 = vmatmul.mubr.msk.bf16.vlgmr.msra.gmra.mrb[44].mxu0 %vm339_vm0, %v1465_v60  ;;  %2235 = vmatmul.mubr.msk.bf16.vlgmr.msra.gmra.mrb[44].mxu1 %vm339_vm0, %v1466_v61 }
 0x412   : > { %v1557_v57 = vpop.f32.mrb[32].mxu1 }
 0x413   : > { %v2200_v62 = vpop.f32.mrb[33].mxu1 }
 0x414   : > { %v1560_v51 = vpop.f32.mrb[34].mxu1 }
 0x415   : > { %v2201_v63 = vpop.f32.mrb[35].mxu1 }
 0x416   : > { %v1511_v58 = vpop.f32.mrb[32].mxu0 }
 0x417   : > { %v1558_v53 = vadd.f32 %v1557_v57, %v1511_v58  ;;  %v2194_v1 = vpop.f32.mrb[33].mxu0 }
 0x418   : > { %v1514_v0 = vpop.f32.mrb[34].mxu0 }
 0x419   : > { %v2195_v2 = vpop.f32.mrb[35].mxu0 }
 0x41e   : > { %v1605_v3 = vpop.f32.mrb[36].mxu0  ;;  %v1654_v55 = vpop.f32.mrb[36].mxu1 }
 0x41f   : > { %v1611_v5 = vadd.f32 %v1605_v3, %v1558_v53  ;;  %v2206_v9 = vpop.f32.mrb[37].mxu0  ;;  %v2212_v13 = vpop.f32.mrb[37].mxu1 }
 0x420   : > { %v1608_v59 = vpop.f32.mrb[38].mxu0  ;;  %v1657_v17 = vpop.f32.mrb[38].mxu1 }
 0x421   : > { %v1660_v22 = vadd.f32 %v1654_v55, %v1611_v5  ;;  %v2207_v23 = vpop.f32.mrb[39].mxu0  ;;  %v2213_v4 = vpop.f32.mrb[39].mxu1 }
 0x426   : > { %v1703_v6 = vpop.f32.mrb[40].mxu0  ;;  %v1752_v8 = vpop.f32.mrb[40].mxu1 }
 0x427   : > { %v1709_v24 = vadd.f32 %v1703_v6, %v1660_v22  ;;  %v2218_v7 = vpop.f32.mrb[41].mxu0  ;;  %v2224_v10 = vpop.f32.mrb[41].mxu1 }
 0x428   : > { %v1706_v11 = vpop.f32.mrb[42].mxu0  ;;  %v1755_v12 = vpop.f32.mrb[42].mxu1 }
 0x429   : > { %v1758_v14 = vadd.f32 %v1752_v8, %v1709_v24  ;;  %v2219_v15 = vpop.f32.mrb[43].mxu0  ;;  %v2225_v16 = vpop.f32.mrb[43].mxu1 }
 0x42e   : > { %v1801_v18 = vpop.f32.mrb[44].mxu0  ;;  %v1850_v21 = vpop.f32.mrb[44].mxu1 }
 0x42f   : > { %v1807_v26 = vadd.f32 %v1801_v18, %v1758_v14  ;;  %v2230_v25 = vpop.f32.mrb[45].mxu0  ;;  %v2236_v19 = vpop.f32.mrb[45].mxu1 }
 0x430   : > { %v1804_v30 = vpop.f32.mrb[46].mxu0  ;;  %v1853_v32 = vpop.f32.mrb[46].mxu1 }
 0x431   : > { %v1856_v27 = vadd.f32 %v1850_v21, %v1807_v26  ;;  %v2231_v20 = vpop.f32.mrb[47].mxu0  ;;  %v2237_v29 = vpop.f32.mrb[47].mxu1 }
 0x433   : > { %v1864_v31 = vadd.f32 %v2038_v28, %v1856_v27 }
 0x435   : > { %1866 = vst.msk [vmem:[%s292_s9] sm:$0xff] %vm1865_vm6, %v1864_v31 }
 0x436   : > { %2360 = shalt.err (!%p2357_p5)
}
 0x437   : > { %s2361_s24 = scalar_lea.hbm %s2932_s13, 128  ;;  %s2365_s29 = scalar_lea.hbm %s2984_s5, 256 }
 0x438   : > { %p2362_p6 = scmp.ne.s32.totalorder %s2932_s13, %s2361_s24  ;;  %p2366_p10 = scmp.lt.u32.totalorder %s2932_s13, %s2984_s5 }
 0x439   : > { %p2367_p11 = scmp.lt.u32.totalorder %s2365_s29, %s2361_s24  ;;  %p2369_p13 = scmp.lt.u32.totalorder %s2361_s24, %s2932_s13 }
 0x43a   : > { %p2363_p7 = pnand %p2362_p6, %p2502_p4 }
 0x43b   : > { %p2368_p12 = por %p2367_p11, %p2366_p10 }
 0x43c   : > { %p2364_p9 = pneg %p2363_p7 }
 0x43d   : > { %p2370_p0 = por %p2369_p13, %p2368_p12 }
 0x43f   : > { %p2371_p1 = pnand %p2370_p0, %p2364_p9 }
 0x441   : > { %2374 = shalt.err (!%p2371_p1)
}
 0x442   : > { %2238 = dma.vmem_to_hbm [thread:$0]  (%p2502_p4), %s2934_s10, 128, %s2932_s13, %s1868_s14  }
 0x443 PF: > { %p2244_p2 = scmp.ge.s32.totalorder %s2425_s23, 2  ;;  %s1894_s9 = sand.u32 1, %s2405_s18  }
 0x444   : > { %s1895_s11 = scalar_lea.sflag [#allocation6], %s1894_s9 }
 0x445   : > { %p2241_p3 = pnand %p2244_p2, %p2509_p8 }
 0x447   : > { %2400 = dma.done.wait (!%p2241_p3), %s1895_s11, 128  }
 0x448   : > { %2402 = vsyncadd (!%p2241_p3), %s1895_s11, 4294967168  ;;  %s18_s23 = sadd.s32 1, %s2425_s23   ;;  %s2987_s18 = smov %s2409_s19 }
 0x449   : > { %p15_p5 = scmp.ge.s32.totalorder %s18_s23, 4   ;;  %s2988_s19 = smov %s2413_s20 }
 0x44a   : > { %s2989_s20 = smov %s2515_s6  ;;  %s2990_s21 = smov %s2421_s22 }
 0x44b   : > { %s2991_s22 = smov %s2993_s26  ;;  %17 = sbr.rel (!%p15_p5) target bundleno = 4 (0x4), region = 96 }
 0x452   :  { %1900 = vsyncpa [#allocation6], 1 }
 0x453   :  { %1902 = vsyncpa [#allocation6 + $0x1], 1 }

</bundles_post_ra>
